<compile_context>
chip_gen: v5e
topology: v5e:2x2
jax: 0.10.0
libtpu: 0.0.40
codegen_flags: <defaults>
</compile_context>

<pallas_src>
import jax
import jax.numpy as jnp
from jax.experimental import pallas as pl
from jax.experimental.pallas import tpu as pltpu


# --------------------------- attention on one row -----------------------------

def _attn_row(vrow):
    """out[j] = sum_i v_i * softmax_i(v_i * v_j)  for a (1, n) row v.

    * outer product s = v^T v on the MXU (dot_general contracting the size-1 axis)
    * column max of s in O(n): m_j = v_j*max(v) if v_j >= 0 else v_j*min(v)
      (any per-column shift cancels in num/den; the true max keeps e <= 1)
    * num_j = sum_i v_i e_ij and den_j = sum_i e_ij from ONE MXU matmul ([v;1] @ e)
    """
    f32 = jnp.float32
    n = vrow.shape[1]
    s = jax.lax.dot_general(vrow, vrow, (((0,), (0,)), ((), ())),
                            preferred_element_type=f32)            # (n, n) = v_i*v_j
    vmax = jnp.max(vrow, axis=1, keepdims=True)                    # (1, 1)
    vmin = jnp.min(vrow, axis=1, keepdims=True)                    # (1, 1)
    m = jnp.where(vrow >= 0, vrow * vmax, vrow * vmin)             # (1, n) column max
    e = jnp.exp(s - m)                                             # (n, n)
    rid = jax.lax.broadcasted_iota(jnp.int32, (2, n), 0)
    vo = jnp.where(rid == 0, jnp.broadcast_to(vrow, (2, n)), 1.0)  # stacked [v; 1]
    nd = jnp.dot(vo, e, preferred_element_type=f32)                # (2, n): [num; den]
    return nd[0:1, :] * pl.reciprocal(nd[1:2, :], approx=True)     # (1, n)


# --------------------------------- kernel -------------------------------------

def _oab_kernel(x_ref, wd_ref, bd_ref, wu_ref, bu_ref,
                pw_ref, ph_ref, sf_ref, st_ref, cm_ref, bw_ref, bh_ref,
                detal_ref, o_ref, xz_sc, ya_sc):
    f32 = jnp.float32
    HW = pw_ref.shape[0]
    L = x_ref.shape[1]          # Bb * HW (lane-dense slab width)
    Bb = L // HW

    xb = x_ref[...]                                                         # (ic, L)
    inp = jnp.dot(wd_ref[...], xb, preferred_element_type=f32) + bd_ref[...]  # (C, L)
    vy_all = jnp.mean(inp, axis=0, keepdims=True)                           # (1, L)

    pw = pw_ref[...]; ph = ph_ref[...]
    sf = sf_ref[...]; st = st_ref[...]; cm = cm_ref[...]
    bw = bw_ref[...]; bh = bh_ref[...]

    # Bb is a small static constant -> unrolled Python loop over the packed batch.
    for b in range(Bb):
        lo = b * HW
        inp_b = inp[:, lo:lo + HW]                                          # (C, HW)

        # x branch: mean over W -> (C, H) -> flatten to (1, C*H) in c*H + h order
        px = jnp.dot(inp_b, pw, preferred_element_type=f32)                 # (C, H)
        vx = jnp.sum(jnp.dot(px, sf, preferred_element_type=f32) * cm,
                     axis=0, keepdims=True)                                 # (1, C*H)
        # z branch: mean over H -> (C, W) -> flatten to (1, C*W) in c*W + w order
        pz = jnp.dot(inp_b, ph, preferred_element_type=f32)                 # (C, W)
        vz = jnp.sum(jnp.dot(pz, sf, preferred_element_type=f32) * cm,
                     axis=0, keepdims=True)                                 # (1, C*W)
        # y branch: mean over channels (computed once on the whole slab)
        vy = vy_all[:, lo:lo + HW]                                          # (1, HW)

        xatt = _attn_row(vx)                                                # (1, C*H)
        zatt = _attn_row(vz)                                                # (1, C*W)
        yatt = _attn_row(vy)                                                # (1, HW)

        # un-flatten (gather) and broadcast back to (C, HW)
        xr = jnp.dot(cm * xatt, st, preferred_element_type=f32)             # (C, H)
        zr = jnp.dot(cm * zatt, st, preferred_element_type=f32)             # (C, W)
        fx = jnp.dot(xr, bw, preferred_element_type=f32)                    # broadcast over W
        fz = jnp.dot(zr, bh, preferred_element_type=f32)                    # broadcast over H

        xz_sc[:, lo:lo + HW] = (fx + fz) * inp_b
        ya_sc[:, lo:lo + HW] = yatt

    up = jnp.dot(wu_ref[...], xz_sc[...], preferred_element_type=f32) + bu_ref[...]  # (ic, L)
    o_ref[...] = xb * ya_sc[...] + detal_ref[0, 0] * up


# -------------------------------- wrapper --------------------------------------

def _oab_forward_impl(x, wd, bd, wu, bu, detal):
    f32 = jnp.float32
    B, ic, H, W = x.shape
    assert H == W, "OAB's z-branch .view(B, C, 1, H) requires square spatial dims"
    C = wd.shape[0]
    HW, CH = H * W, C * H

    # pick Bb = smallest divisor of B giving >= 128 lanes (capped to keep VMEM small)
    Bb = 1
    for cand in range(1, B + 1):
        if B % cand == 0 and cand * HW <= 2048:
            Bb = cand
            if cand * HW >= 128:
                break
    G = B // Bb
    L = Bb * HW

    # small factored selector / averaging constants (shared across batch slices)
    s_idx = jnp.arange(HW)
    h_of_s = s_idx // W
    w_of_s = s_idx % W
    h_idx = jnp.arange(H)
    w_idx = jnp.arange(W)
    n_idx = jnp.arange(CH)
    c_of_n = n_idx // H
    p_of_n = n_idx % H
    c_idx = jnp.arange(C)

    pw = (h_of_s[:, None] == h_idx[None, :]).astype(f32) / W     # (HW, H)  mean over W
    ph = (w_of_s[:, None] == w_idx[None, :]).astype(f32) / H     # (HW, W)  mean over H
    sf = (h_idx[:, None] == p_of_n[None, :]).astype(f32)         # (H, CH)  flatten scatter
    st = (p_of_n[:, None] == h_idx[None, :]).astype(f32)         # (CH, H)  un-flatten gather
    cm = (c_idx[:, None] == c_of_n[None, :]).astype(f32)         # (C, CH)  channel mask
    bw = (h_idx[:, None] == h_of_s[None, :]).astype(f32)         # (H, HW)  broadcast over W
    bh = (w_idx[:, None] == w_of_s[None, :]).astype(f32)         # (W, HW)  broadcast over H

    # pack Bb batch elements along the lane axis: (B, ic, HW) -> (G, ic, Bb*HW)
    x_p = (x.reshape(B, ic, HW)
             .reshape(G, Bb, ic, HW)
             .transpose(0, 2, 1, 3)
             .reshape(G, ic, L)
             .astype(f32))
    bd2 = bd.reshape(C, 1).astype(f32)
    bu2 = bu.reshape(ic, 1).astype(f32)
    detal2 = jnp.asarray(detal, f32).reshape(1, 1)

    cost = pl.CostEstimate(
        flops=int(B * (4 * C * ic * HW + 4 * (2 * CH * CH + HW * HW)
                       + 12 * C * HW + 4 * ic * HW)),
        transcendentals=int(B * (2 * CH * CH + HW * HW)),
        bytes_accessed=int(4 * (2 * B * ic * HW + 2 * C * ic + C + ic
                                + 2 * HW * H + 2 * H * CH + C * CH + 2 * H * HW)),
    )

    out_p = pl.pallas_call(
        _oab_kernel,
        grid=(G,),
        in_specs=[
            pl.BlockSpec((None, ic, L), lambda g: (g, 0, 0)),      # x slab
            pl.BlockSpec((C, ic), lambda g: (0, 0)),               # convdown weight
            pl.BlockSpec((C, 1), lambda g: (0, 0)),                # convdown bias
            pl.BlockSpec((ic, C), lambda g: (0, 0)),               # convup weight
            pl.BlockSpec((ic, 1), lambda g: (0, 0)),               # convup bias
            pl.BlockSpec((HW, H), lambda g: (0, 0)),               # pw
            pl.BlockSpec((HW, W), lambda g: (0, 0)),               # ph
            pl.BlockSpec((H, CH), lambda g: (0, 0)),               # sf
            pl.BlockSpec((CH, H), lambda g: (0, 0)),               # st
            pl.BlockSpec((C, CH), lambda g: (0, 0)),               # cm
            pl.BlockSpec((H, HW), lambda g: (0, 0)),               # bw
            pl.BlockSpec((W, HW), lambda g: (0, 0)),               # bh
            pl.BlockSpec(memory_space=pltpu.MemorySpace.SMEM),     # detal scalar
        ],
        out_specs=pl.BlockSpec((None, ic, L), lambda g: (g, 0, 0)),
        out_shape=jax.ShapeDtypeStruct((G, ic, L), f32),
        scratch_shapes=[pltpu.VMEM((C, L), f32), pltpu.VMEM((1, L), f32)],
        compiler_params=pltpu.CompilerParams(dimension_semantics=("parallel",)),
        cost_estimate=cost,
    )(x_p, wd.astype(f32), bd2, wu.astype(f32), bu2,
      pw, ph, sf, st, cm, bw, bh, detal2)

    # unpack (G, ic, Bb*HW) -> (B, ic, H, W)
    return (out_p.reshape(G, ic, Bb, HW)
                 .transpose(0, 2, 1, 3)
                 .reshape(B, ic, H, W))


oab_forward = jax.jit(_oab_forward_impl)


# --------------------------- pure-JAX reference --------------------------------

def oab_reference(x, wd, bd, wu, bu, detal):
    B, ic, H, W = x.shape
    inp = jnp.einsum('oi,bihw->bohw', wd, x) + bd[None, :, None, None]
    C = inp.shape[1]
    vx = inp.mean(axis=3).reshape(B, 1, C * H)
    gx = jax.nn.softmax(jnp.matmul(jnp.transpose(vx, (0, 2, 1)), vx), axis=1)
    x_out = jnp.matmul(vx, gx).reshape(B, C, H, 1)
    vz = inp.mean(axis=2).reshape(B, 1, C * W)
    gz = jax.nn.softmax(jnp.matmul(jnp.transpose(vz, (0, 2, 1)), vz), axis=1)
    z_out = jnp.matmul(vz, gz).reshape(B, C, 1, W)
    vy = inp.mean(axis=1).reshape(B, 1, H * W)
    gy = jax.nn.softmax(jnp.matmul(jnp.transpose(vy, (0, 2, 1)), vy), axis=1)
    y_out = jnp.matmul(vy, gy).reshape(B, 1, H, W)
    xz_att = jnp.einsum('oi,bihw->bohw', wu, (x_out + z_out) * inp) + bu[None, :, None, None]
    return x * y_out + detal.reshape(()) * xz_att


# ----------------------------------- main ---------------------------------------

if __name__ == "__main__":
    B, ic, H, W = 2, 32, 8, 8          # ic=32 -> bottleneck channels C = ic // 16 = 2
    C = ic // 16
    key = jax.random.PRNGKey(0)
    k1, k2, k3, k4, k5 = jax.random.split(key, 5)
    x = jax.random.normal(k1, (B, ic, H, W), jnp.float32)
    wd = jax.random.normal(k2, (C, ic), jnp.float32) * 0.1    # convdown weight (1x1)
    bd = jax.random.normal(k3, (C,), jnp.float32) * 0.1       # convdown bias
    wu = jax.random.normal(k4, (ic, C), jnp.float32) * 0.1    # convup weight (1x1)
    bu = jax.random.normal(k5, (ic,), jnp.float32) * 0.1      # convup bias
    detal = jnp.array([0.1], jnp.float32)                     # nn.Parameter([0.1])

    out = oab_forward(x, wd, bd, wu, bu, detal)
    out = jax.block_until_ready(out)

    ref = oab_reference(x, wd, bd, wu, bu, detal)
    assert out.shape == ref.shape == (B, ic, H, W)
    err = float(jnp.max(jnp.abs(out - ref)))
    # 2e-3 tolerance covers the approximate EUP reciprocal used for the softmax
    # denominator; everything else is f32 with f32 accumulation.
    assert jnp.allclose(out, ref, rtol=2e-3, atol=2e-3), err
    print("KERNEL_OK")
</pallas_src>

<mosaic_0001>
module attributes {stable_mosaic.version = 11 : i64} {
  func.func @_oab_kernel(%arg0: i32, %arg1: memref<1x32x128xf32, #tpu.memory_space<vmem>>, %arg2: memref<2x32xf32, #tpu.memory_space<vmem>>, %arg3: memref<2x1xf32, #tpu.memory_space<vmem>>, %arg4: memref<32x2xf32, #tpu.memory_space<vmem>>, %arg5: memref<32x1xf32, #tpu.memory_space<vmem>>, %arg6: memref<64x8xf32, #tpu.memory_space<vmem>>, %arg7: memref<64x8xf32, #tpu.memory_space<vmem>>, %arg8: memref<8x16xf32, #tpu.memory_space<vmem>>, %arg9: memref<16x8xf32, #tpu.memory_space<vmem>>, %arg10: memref<2x16xf32, #tpu.memory_space<vmem>>, %arg11: memref<8x64xf32, #tpu.memory_space<vmem>>, %arg12: memref<8x64xf32, #tpu.memory_space<vmem>>, %arg13: memref<1x1xf32, #tpu.memory_space<smem>>, %arg14: memref<1x32x128xf32, #tpu.memory_space<vmem>>, %arg15: memref<2x128xf32, #tpu.memory_space<vmem>>, %arg16: memref<1x128xf32, #tpu.memory_space<vmem>>) attributes {dimension_semantics = [#tpu.dimension_semantics<parallel>], iteration_bounds = array<i64: 1>, scalar_prefetch = 0 : i64, scratch_operands = 2 : i64, tpu.core_type = #tpu.core_type<tc>, window_params = [{transform_indices = @transform_0, window_bounds = array<i64: 1, 32, 128>}, {pipeline_mode = #tpu.pipeline_mode<synchronous>, transform_indices = @transform_1, window_bounds = array<i64: 2, 32>}, {pipeline_mode = #tpu.pipeline_mode<synchronous>, transform_indices = @transform_2, window_bounds = array<i64: 2, 1>}, {pipeline_mode = #tpu.pipeline_mode<synchronous>, transform_indices = @transform_3, window_bounds = array<i64: 32, 2>}, {pipeline_mode = #tpu.pipeline_mode<synchronous>, transform_indices = @transform_4, window_bounds = array<i64: 32, 1>}, {pipeline_mode = #tpu.pipeline_mode<synchronous>, transform_indices = @transform_5, window_bounds = array<i64: 64, 8>}, {pipeline_mode = #tpu.pipeline_mode<synchronous>, transform_indices = @transform_6, window_bounds = array<i64: 64, 8>}, {pipeline_mode = #tpu.pipeline_mode<synchronous>, transform_indices = @transform_7, window_bounds = array<i64: 8, 16>}, {pipeline_mode = #tpu.pipeline_mode<synchronous>, transform_indices = @transform_8, window_bounds = array<i64: 16, 8>}, {pipeline_mode = #tpu.pipeline_mode<synchronous>, transform_indices = @transform_9, window_bounds = array<i64: 2, 16>}, {pipeline_mode = #tpu.pipeline_mode<synchronous>, transform_indices = @transform_10, window_bounds = array<i64: 8, 64>}, {pipeline_mode = #tpu.pipeline_mode<synchronous>, transform_indices = @transform_11, window_bounds = array<i64: 8, 64>}, {transform_indices = @transform_12, window_bounds = array<i64: 1, 1>}, {transform_indices = @transform_13, window_bounds = array<i64: 1, 32, 128>}]} {
    %c0 = arith.constant 0 : index
    %c0_0 = arith.constant 0 : index
    %c0_1 = arith.constant 0 : index
    %0 = vector.load %arg1[%c0, %c0_0, %c0_1] : memref<1x32x128xf32, #tpu.memory_space<vmem>>, vector<1x32x128xf32>
    %1 = vector.shape_cast %0 : vector<1x32x128xf32> to vector<32x128xf32>
    %c0_2 = arith.constant 0 : index
    %c0_3 = arith.constant 0 : index
    %2 = vector.load %arg2[%c0_2, %c0_3] : memref<2x32xf32, #tpu.memory_space<vmem>>, vector<2x32xf32>
    %cst = arith.constant dense<0.000000e+00> : vector<2x128xf32>
    %3 = tpu.matmul %2, %1, %cst {dimension_numbers = #tpu.dot_dimension_numbers<[1], [0], [0], [1], [0, 0, 1, 1], [], []>} : vector<2x32xf32>, vector<32x128xf32>, vector<2x128xf32> -> vector<2x128xf32>
    %c0_4 = arith.constant 0 : index
    %c0_5 = arith.constant 0 : index
    %4 = vector.load %arg3[%c0_4, %c0_5] : memref<2x1xf32, #tpu.memory_space<vmem>>, vector<2x1xf32>
    %5 = vector.broadcast %4 : vector<2x1xf32> to vector<2x128xf32>
    %6 = arith.addf %3, %5 : vector<2x128xf32>
    %cst_6 = arith.constant dense<0.000000e+00> : vector<128xf32>
    %7 = vector.multi_reduction <add>, %6, %cst_6 [0] : vector<2x128xf32> to vector<128xf32>
    %8 = vector.shape_cast %7 : vector<128xf32> to vector<1x128xf32>
    %cst_7 = arith.constant 2.000000e+00 : f32
    %9 = vector.broadcast %cst_7 : f32 to vector<1x128xf32>
    %10 = arith.divf %8, %9 : vector<1x128xf32>
    %c0_8 = arith.constant 0 : index
    %c0_9 = arith.constant 0 : index
    %11 = vector.load %arg6[%c0_8, %c0_9] : memref<64x8xf32, #tpu.memory_space<vmem>>, vector<64x8xf32>
    %c0_10 = arith.constant 0 : index
    %c0_11 = arith.constant 0 : index
    %12 = vector.load %arg7[%c0_10, %c0_11] : memref<64x8xf32, #tpu.memory_space<vmem>>, vector<64x8xf32>
    %c0_12 = arith.constant 0 : index
    %c0_13 = arith.constant 0 : index
    %13 = vector.load %arg8[%c0_12, %c0_13] : memref<8x16xf32, #tpu.memory_space<vmem>>, vector<8x16xf32>
    %c0_14 = arith.constant 0 : index
    %c0_15 = arith.constant 0 : index
    %14 = vector.load %arg9[%c0_14, %c0_15] : memref<16x8xf32, #tpu.memory_space<vmem>>, vector<16x8xf32>
    %c0_16 = arith.constant 0 : index
    %c0_17 = arith.constant 0 : index
    %15 = vector.load %arg10[%c0_16, %c0_17] : memref<2x16xf32, #tpu.memory_space<vmem>>, vector<2x16xf32>
    %c0_18 = arith.constant 0 : index
    %c0_19 = arith.constant 0 : index
    %16 = vector.load %arg11[%c0_18, %c0_19] : memref<8x64xf32, #tpu.memory_space<vmem>>, vector<8x64xf32>
    %c0_20 = arith.constant 0 : index
    %c0_21 = arith.constant 0 : index
    %17 = vector.load %arg12[%c0_20, %c0_21] : memref<8x64xf32, #tpu.memory_space<vmem>>, vector<8x64xf32>
    %18 = vector.extract_strided_slice %6 {offsets = [0, 0], sizes = [2, 64], strides = [1, 1]} : vector<2x128xf32> to vector<2x64xf32>
    %cst_22 = arith.constant dense<0.000000e+00> : vector<2x8xf32>
    %19 = tpu.matmul %18, %11, %cst_22 {dimension_numbers = #tpu.dot_dimension_numbers<[1], [0], [0], [1], [0, 0, 1, 1], [], []>} : vector<2x64xf32>, vector<64x8xf32>, vector<2x8xf32> -> vector<2x8xf32>
    %cst_23 = arith.constant dense<0.000000e+00> : vector<2x16xf32>
    %20 = tpu.matmul %19, %13, %cst_23 {dimension_numbers = #tpu.dot_dimension_numbers<[1], [0], [0], [1], [0, 0, 1, 1], [], []>} : vector<2x8xf32>, vector<8x16xf32>, vector<2x16xf32> -> vector<2x16xf32>
    %21 = arith.mulf %20, %15 : vector<2x16xf32>
    %cst_24 = arith.constant dense<0.000000e+00> : vector<16xf32>
    %22 = vector.multi_reduction <add>, %21, %cst_24 [0] : vector<2x16xf32> to vector<16xf32>
    %23 = vector.shape_cast %22 : vector<16xf32> to vector<1x16xf32>
    %cst_25 = arith.constant dense<0.000000e+00> : vector<2x8xf32>
    %24 = tpu.matmul %18, %12, %cst_25 {dimension_numbers = #tpu.dot_dimension_numbers<[1], [0], [0], [1], [0, 0, 1, 1], [], []>} : vector<2x64xf32>, vector<64x8xf32>, vector<2x8xf32> -> vector<2x8xf32>
    %cst_26 = arith.constant dense<0.000000e+00> : vector<2x16xf32>
    %25 = tpu.matmul %24, %13, %cst_26 {dimension_numbers = #tpu.dot_dimension_numbers<[1], [0], [0], [1], [0, 0, 1, 1], [], []>} : vector<2x8xf32>, vector<8x16xf32>, vector<2x16xf32> -> vector<2x16xf32>
    %26 = arith.mulf %25, %15 : vector<2x16xf32>
    %cst_27 = arith.constant dense<0.000000e+00> : vector<16xf32>
    %27 = vector.multi_reduction <add>, %26, %cst_27 [0] : vector<2x16xf32> to vector<16xf32>
    %28 = vector.shape_cast %27 : vector<16xf32> to vector<1x16xf32>
    %29 = vector.extract_strided_slice %10 {offsets = [0, 0], sizes = [1, 64], strides = [1, 1]} : vector<1x128xf32> to vector<1x64xf32>
    %cst_28 = arith.constant dense<0.000000e+00> : vector<16x16xf32>
    %30 = tpu.matmul %23, %23, %cst_28 {dimension_numbers = #tpu.dot_dimension_numbers<[0], [0], [1], [1], [0, 1, 1, 1], [], []>} : vector<1x16xf32>, vector<1x16xf32>, vector<16x16xf32> -> vector<16x16xf32>
    %cst_29 = arith.constant dense<0xFF800000> : vector<1xf32>
    %31 = vector.multi_reduction <maximumf>, %23, %cst_29 [1] : vector<1x16xf32> to vector<1xf32>
    %32 = vector.shape_cast %31 : vector<1xf32> to vector<1x1xf32>
    %cst_30 = arith.constant dense<0x7F800000> : vector<1xf32>
    %33 = vector.multi_reduction <minimumf>, %23, %cst_30 [1] : vector<1x16xf32> to vector<1xf32>
    %34 = vector.shape_cast %33 : vector<1xf32> to vector<1x1xf32>
    %cst_31 = arith.constant 0.000000e+00 : f32
    %35 = vector.broadcast %cst_31 : f32 to vector<1x16xf32>
    %36 = arith.cmpf oge, %23, %35 : vector<1x16xf32>
    %37 = vector.broadcast %32 : vector<1x1xf32> to vector<1x16xf32>
    %38 = arith.mulf %23, %37 : vector<1x16xf32>
    %39 = vector.broadcast %34 : vector<1x1xf32> to vector<1x16xf32>
    %40 = arith.mulf %23, %39 : vector<1x16xf32>
    %41 = arith.select %36, %38, %40 : vector<1x16xi1>, vector<1x16xf32>
    %42 = vector.broadcast %41 : vector<1x16xf32> to vector<16x16xf32>
    %43 = arith.subf %30, %42 : vector<16x16xf32>
    %44 = math.exp %43 : vector<16x16xf32>
    %45 = tpu.iota {dimensions = array<i32: 0>} : vector<2x16xi32>
    %c0_i32 = arith.constant 0 : i32
    %46 = vector.broadcast %c0_i32 : i32 to vector<2x16xi32>
    %47 = arith.cmpi eq, %45, %46 : vector<2x16xi32>
    %48 = vector.shape_cast %23 : vector<1x16xf32> to vector<1x16xf32>
    %49 = vector.broadcast %48 : vector<1x16xf32> to vector<2x16xf32>
    %cst_32 = arith.constant 1.000000e+00 : f32
    %50 = vector.broadcast %cst_32 : f32 to vector<2x16xf32>
    %51 = arith.select %47, %49, %50 : vector<2x16xi1>, vector<2x16xf32>
    %cst_33 = arith.constant dense<0.000000e+00> : vector<2x16xf32>
    %52 = tpu.matmul %51, %44, %cst_33 {dimension_numbers = #tpu.dot_dimension_numbers<[1], [0], [0], [1], [0, 0, 1, 1], [], []>} : vector<2x16xf32>, vector<16x16xf32>, vector<2x16xf32> -> vector<2x16xf32>
    %53 = vector.extract_strided_slice %52 {offsets = [0, 0], sizes = [1, 16], strides = [1, 1]} : vector<2x16xf32> to vector<1x16xf32>
    %54 = vector.extract_strided_slice %52 {offsets = [1, 0], sizes = [1, 16], strides = [1, 1]} : vector<2x16xf32> to vector<1x16xf32>
    %55 = tpu.reciprocal %54 {approx = true} : vector<1x16xf32> -> vector<1x16xf32>
    %56 = arith.mulf %53, %55 : vector<1x16xf32>
    %cst_34 = arith.constant dense<0.000000e+00> : vector<16x16xf32>
    %57 = tpu.matmul %28, %28, %cst_34 {dimension_numbers = #tpu.dot_dimension_numbers<[0], [0], [1], [1], [0, 1, 1, 1], [], []>} : vector<1x16xf32>, vector<1x16xf32>, vector<16x16xf32> -> vector<16x16xf32>
    %cst_35 = arith.constant dense<0xFF800000> : vector<1xf32>
    %58 = vector.multi_reduction <maximumf>, %28, %cst_35 [1] : vector<1x16xf32> to vector<1xf32>
    %59 = vector.shape_cast %58 : vector<1xf32> to vector<1x1xf32>
    %cst_36 = arith.constant dense<0x7F800000> : vector<1xf32>
    %60 = vector.multi_reduction <minimumf>, %28, %cst_36 [1] : vector<1x16xf32> to vector<1xf32>
    %61 = vector.shape_cast %60 : vector<1xf32> to vector<1x1xf32>
    %cst_37 = arith.constant 0.000000e+00 : f32
    %62 = vector.broadcast %cst_37 : f32 to vector<1x16xf32>
    %63 = arith.cmpf oge, %28, %62 : vector<1x16xf32>
    %64 = vector.broadcast %59 : vector<1x1xf32> to vector<1x16xf32>
    %65 = arith.mulf %28, %64 : vector<1x16xf32>
    %66 = vector.broadcast %61 : vector<1x1xf32> to vector<1x16xf32>
    %67 = arith.mulf %28, %66 : vector<1x16xf32>
    %68 = arith.select %63, %65, %67 : vector<1x16xi1>, vector<1x16xf32>
    %69 = vector.broadcast %68 : vector<1x16xf32> to vector<16x16xf32>
    %70 = arith.subf %57, %69 : vector<16x16xf32>
    %71 = math.exp %70 : vector<16x16xf32>
    %72 = tpu.iota {dimensions = array<i32: 0>} : vector<2x16xi32>
    %c0_i32_38 = arith.constant 0 : i32
    %73 = vector.broadcast %c0_i32_38 : i32 to vector<2x16xi32>
    %74 = arith.cmpi eq, %72, %73 : vector<2x16xi32>
    %75 = vector.shape_cast %28 : vector<1x16xf32> to vector<1x16xf32>
    %76 = vector.broadcast %75 : vector<1x16xf32> to vector<2x16xf32>
    %cst_39 = arith.constant 1.000000e+00 : f32
    %77 = vector.broadcast %cst_39 : f32 to vector<2x16xf32>
    %78 = arith.select %74, %76, %77 : vector<2x16xi1>, vector<2x16xf32>
    %cst_40 = arith.constant dense<0.000000e+00> : vector<2x16xf32>
    %79 = tpu.matmul %78, %71, %cst_40 {dimension_numbers = #tpu.dot_dimension_numbers<[1], [0], [0], [1], [0, 0, 1, 1], [], []>} : vector<2x16xf32>, vector<16x16xf32>, vector<2x16xf32> -> vector<2x16xf32>
    %80 = vector.extract_strided_slice %79 {offsets = [0, 0], sizes = [1, 16], strides = [1, 1]} : vector<2x16xf32> to vector<1x16xf32>
    %81 = vector.extract_strided_slice %79 {offsets = [1, 0], sizes = [1, 16], strides = [1, 1]} : vector<2x16xf32> to vector<1x16xf32>
    %82 = tpu.reciprocal %81 {approx = true} : vector<1x16xf32> -> vector<1x16xf32>
    %83 = arith.mulf %80, %82 : vector<1x16xf32>
    %cst_41 = arith.constant dense<0.000000e+00> : vector<64x64xf32>
    %84 = tpu.matmul %29, %29, %cst_41 {dimension_numbers = #tpu.dot_dimension_numbers<[0], [0], [1], [1], [0, 1, 1, 1], [], []>} : vector<1x64xf32>, vector<1x64xf32>, vector<64x64xf32> -> vector<64x64xf32>
    %cst_42 = arith.constant dense<0xFF800000> : vector<1xf32>
    %85 = vector.multi_reduction <maximumf>, %29, %cst_42 [1] : vector<1x64xf32> to vector<1xf32>
    %86 = vector.shape_cast %85 : vector<1xf32> to vector<1x1xf32>
    %cst_43 = arith.constant dense<0x7F800000> : vector<1xf32>
    %87 = vector.multi_reduction <minimumf>, %29, %cst_43 [1] : vector<1x64xf32> to vector<1xf32>
    %88 = vector.shape_cast %87 : vector<1xf32> to vector<1x1xf32>
    %cst_44 = arith.constant 0.000000e+00 : f32
    %89 = vector.broadcast %cst_44 : f32 to vector<1x64xf32>
    %90 = arith.cmpf oge, %29, %89 : vector<1x64xf32>
    %91 = vector.broadcast %86 : vector<1x1xf32> to vector<1x64xf32>
    %92 = arith.mulf %29, %91 : vector<1x64xf32>
    %93 = vector.broadcast %88 : vector<1x1xf32> to vector<1x64xf32>
    %94 = arith.mulf %29, %93 : vector<1x64xf32>
    %95 = arith.select %90, %92, %94 : vector<1x64xi1>, vector<1x64xf32>
    %96 = vector.broadcast %95 : vector<1x64xf32> to vector<64x64xf32>
    %97 = arith.subf %84, %96 : vector<64x64xf32>
    %98 = math.exp %97 : vector<64x64xf32>
    %99 = tpu.iota {dimensions = array<i32: 0>} : vector<2x64xi32>
    %c0_i32_45 = arith.constant 0 : i32
    %100 = vector.broadcast %c0_i32_45 : i32 to vector<2x64xi32>
    %101 = arith.cmpi eq, %99, %100 : vector<2x64xi32>
    %102 = vector.shape_cast %29 : vector<1x64xf32> to vector<1x64xf32>
    %103 = vector.broadcast %102 : vector<1x64xf32> to vector<2x64xf32>
    %cst_46 = arith.constant 1.000000e+00 : f32
    %104 = vector.broadcast %cst_46 : f32 to vector<2x64xf32>
    %105 = arith.select %101, %103, %104 : vector<2x64xi1>, vector<2x64xf32>
    %cst_47 = arith.constant dense<0.000000e+00> : vector<2x64xf32>
    %106 = tpu.matmul %105, %98, %cst_47 {dimension_numbers = #tpu.dot_dimension_numbers<[1], [0], [0], [1], [0, 0, 1, 1], [], []>} : vector<2x64xf32>, vector<64x64xf32>, vector<2x64xf32> -> vector<2x64xf32>
    %107 = vector.extract_strided_slice %106 {offsets = [0, 0], sizes = [1, 64], strides = [1, 1]} : vector<2x64xf32> to vector<1x64xf32>
    %108 = vector.extract_strided_slice %106 {offsets = [1, 0], sizes = [1, 64], strides = [1, 1]} : vector<2x64xf32> to vector<1x64xf32>
    %109 = tpu.reciprocal %108 {approx = true} : vector<1x64xf32> -> vector<1x64xf32>
    %110 = arith.mulf %107, %109 : vector<1x64xf32>
    %111 = vector.broadcast %56 : vector<1x16xf32> to vector<2x16xf32>
    %112 = arith.mulf %15, %111 : vector<2x16xf32>
    %cst_48 = arith.constant dense<0.000000e+00> : vector<2x8xf32>
    %113 = tpu.matmul %112, %14, %cst_48 {dimension_numbers = #tpu.dot_dimension_numbers<[1], [0], [0], [1], [0, 0, 1, 1], [], []>} : vector<2x16xf32>, vector<16x8xf32>, vector<2x8xf32> -> vector<2x8xf32>
    %114 = vector.broadcast %83 : vector<1x16xf32> to vector<2x16xf32>
    %115 = arith.mulf %15, %114 : vector<2x16xf32>
    %cst_49 = arith.constant dense<0.000000e+00> : vector<2x8xf32>
    %116 = tpu.matmul %115, %14, %cst_49 {dimension_numbers = #tpu.dot_dimension_numbers<[1], [0], [0], [1], [0, 0, 1, 1], [], []>} : vector<2x16xf32>, vector<16x8xf32>, vector<2x8xf32> -> vector<2x8xf32>
    %cst_50 = arith.constant dense<0.000000e+00> : vector<2x64xf32>
    %117 = tpu.matmul %113, %16, %cst_50 {dimension_numbers = #tpu.dot_dimension_numbers<[1], [0], [0], [1], [0, 0, 1, 1], [], []>} : vector<2x8xf32>, vector<8x64xf32>, vector<2x64xf32> -> vector<2x64xf32>
    %cst_51 = arith.constant dense<0.000000e+00> : vector<2x64xf32>
    %118 = tpu.matmul %116, %17, %cst_51 {dimension_numbers = #tpu.dot_dimension_numbers<[1], [0], [0], [1], [0, 0, 1, 1], [], []>} : vector<2x8xf32>, vector<8x64xf32>, vector<2x64xf32> -> vector<2x64xf32>
    %119 = arith.addf %117, %118 : vector<2x64xf32>
    %120 = arith.mulf %119, %18 : vector<2x64xf32>
    %c0_52 = arith.constant 0 : index
    %c0_53 = arith.constant 0 : index
    %121 = vector.load %arg15[%c0_52, %c0_53] : memref<2x128xf32, #tpu.memory_space<vmem>>, vector<2x64xf32>
    tpu.vector_store %arg15[%c0_52, %c0_53], %120 {strides = array<i32>} : memref<2x128xf32, #tpu.memory_space<vmem>>, vector<2x64xf32>,
    %c0_54 = arith.constant 0 : index
    %c0_55 = arith.constant 0 : index
    %122 = vector.load %arg16[%c0_54, %c0_55] : memref<1x128xf32, #tpu.memory_space<vmem>>, vector<1x64xf32>
    tpu.vector_store %arg16[%c0_54, %c0_55], %110 {strides = array<i32>} : memref<1x128xf32, #tpu.memory_space<vmem>>, vector<1x64xf32>,
    %123 = vector.extract_strided_slice %6 {offsets = [0, 64], sizes = [2, 64], strides = [1, 1]} : vector<2x128xf32> to vector<2x64xf32>
    %cst_56 = arith.constant dense<0.000000e+00> : vector<2x8xf32>
    %124 = tpu.matmul %123, %11, %cst_56 {dimension_numbers = #tpu.dot_dimension_numbers<[1], [0], [0], [1], [0, 0, 1, 1], [], []>} : vector<2x64xf32>, vector<64x8xf32>, vector<2x8xf32> -> vector<2x8xf32>
    %cst_57 = arith.constant dense<0.000000e+00> : vector<2x16xf32>
    %125 = tpu.matmul %124, %13, %cst_57 {dimension_numbers = #tpu.dot_dimension_numbers<[1], [0], [0], [1], [0, 0, 1, 1], [], []>} : vector<2x8xf32>, vector<8x16xf32>, vector<2x16xf32> -> vector<2x16xf32>
    %126 = arith.mulf %125, %15 : vector<2x16xf32>
    %cst_58 = arith.constant dense<0.000000e+00> : vector<16xf32>
    %127 = vector.multi_reduction <add>, %126, %cst_58 [0] : vector<2x16xf32> to vector<16xf32>
    %128 = vector.shape_cast %127 : vector<16xf32> to vector<1x16xf32>
    %cst_59 = arith.constant dense<0.000000e+00> : vector<2x8xf32>
    %129 = tpu.matmul %123, %12, %cst_59 {dimension_numbers = #tpu.dot_dimension_numbers<[1], [0], [0], [1], [0, 0, 1, 1], [], []>} : vector<2x64xf32>, vector<64x8xf32>, vector<2x8xf32> -> vector<2x8xf32>
    %cst_60 = arith.constant dense<0.000000e+00> : vector<2x16xf32>
    %130 = tpu.matmul %129, %13, %cst_60 {dimension_numbers = #tpu.dot_dimension_numbers<[1], [0], [0], [1], [0, 0, 1, 1], [], []>} : vector<2x8xf32>, vector<8x16xf32>, vector<2x16xf32> -> vector<2x16xf32>
    %131 = arith.mulf %130, %15 : vector<2x16xf32>
    %cst_61 = arith.constant dense<0.000000e+00> : vector<16xf32>
    %132 = vector.multi_reduction <add>, %131, %cst_61 [0] : vector<2x16xf32> to vector<16xf32>
    %133 = vector.shape_cast %132 : vector<16xf32> to vector<1x16xf32>
    %134 = vector.extract_strided_slice %10 {offsets = [0, 64], sizes = [1, 64], strides = [1, 1]} : vector<1x128xf32> to vector<1x64xf32>
    %cst_62 = arith.constant dense<0.000000e+00> : vector<16x16xf32>
    %135 = tpu.matmul %128, %128, %cst_62 {dimension_numbers = #tpu.dot_dimension_numbers<[0], [0], [1], [1], [0, 1, 1, 1], [], []>} : vector<1x16xf32>, vector<1x16xf32>, vector<16x16xf32> -> vector<16x16xf32>
    %cst_63 = arith.constant dense<0xFF800000> : vector<1xf32>
    %136 = vector.multi_reduction <maximumf>, %128, %cst_63 [1] : vector<1x16xf32> to vector<1xf32>
    %137 = vector.shape_cast %136 : vector<1xf32> to vector<1x1xf32>
    %cst_64 = arith.constant dense<0x7F800000> : vector<1xf32>
    %138 = vector.multi_reduction <minimumf>, %128, %cst_64 [1] : vector<1x16xf32> to vector<1xf32>
    %139 = vector.shape_cast %138 : vector<1xf32> to vector<1x1xf32>
    %cst_65 = arith.constant 0.000000e+00 : f32
    %140 = vector.broadcast %cst_65 : f32 to vector<1x16xf32>
    %141 = arith.cmpf oge, %128, %140 : vector<1x16xf32>
    %142 = vector.broadcast %137 : vector<1x1xf32> to vector<1x16xf32>
    %143 = arith.mulf %128, %142 : vector<1x16xf32>
    %144 = vector.broadcast %139 : vector<1x1xf32> to vector<1x16xf32>
    %145 = arith.mulf %128, %144 : vector<1x16xf32>
    %146 = arith.select %141, %143, %145 : vector<1x16xi1>, vector<1x16xf32>
    %147 = vector.broadcast %146 : vector<1x16xf32> to vector<16x16xf32>
    %148 = arith.subf %135, %147 : vector<16x16xf32>
    %149 = math.exp %148 : vector<16x16xf32>
    %150 = tpu.iota {dimensions = array<i32: 0>} : vector<2x16xi32>
    %c0_i32_66 = arith.constant 0 : i32
    %151 = vector.broadcast %c0_i32_66 : i32 to vector<2x16xi32>
    %152 = arith.cmpi eq, %150, %151 : vector<2x16xi32>
    %153 = vector.shape_cast %128 : vector<1x16xf32> to vector<1x16xf32>
    %154 = vector.broadcast %153 : vector<1x16xf32> to vector<2x16xf32>
    %cst_67 = arith.constant 1.000000e+00 : f32
    %155 = vector.broadcast %cst_67 : f32 to vector<2x16xf32>
    %156 = arith.select %152, %154, %155 : vector<2x16xi1>, vector<2x16xf32>
    %cst_68 = arith.constant dense<0.000000e+00> : vector<2x16xf32>
    %157 = tpu.matmul %156, %149, %cst_68 {dimension_numbers = #tpu.dot_dimension_numbers<[1], [0], [0], [1], [0, 0, 1, 1], [], []>} : vector<2x16xf32>, vector<16x16xf32>, vector<2x16xf32> -> vector<2x16xf32>
    %158 = vector.extract_strided_slice %157 {offsets = [0, 0], sizes = [1, 16], strides = [1, 1]} : vector<2x16xf32> to vector<1x16xf32>
    %159 = vector.extract_strided_slice %157 {offsets = [1, 0], sizes = [1, 16], strides = [1, 1]} : vector<2x16xf32> to vector<1x16xf32>
    %160 = tpu.reciprocal %159 {approx = true} : vector<1x16xf32> -> vector<1x16xf32>
    %161 = arith.mulf %158, %160 : vector<1x16xf32>
    %cst_69 = arith.constant dense<0.000000e+00> : vector<16x16xf32>
    %162 = tpu.matmul %133, %133, %cst_69 {dimension_numbers = #tpu.dot_dimension_numbers<[0], [0], [1], [1], [0, 1, 1, 1], [], []>} : vector<1x16xf32>, vector<1x16xf32>, vector<16x16xf32> -> vector<16x16xf32>
    %cst_70 = arith.constant dense<0xFF800000> : vector<1xf32>
    %163 = vector.multi_reduction <maximumf>, %133, %cst_70 [1] : vector<1x16xf32> to vector<1xf32>
    %164 = vector.shape_cast %163 : vector<1xf32> to vector<1x1xf32>
    %cst_71 = arith.constant dense<0x7F800000> : vector<1xf32>
    %165 = vector.multi_reduction <minimumf>, %133, %cst_71 [1] : vector<1x16xf32> to vector<1xf32>
    %166 = vector.shape_cast %165 : vector<1xf32> to vector<1x1xf32>
    %cst_72 = arith.constant 0.000000e+00 : f32
    %167 = vector.broadcast %cst_72 : f32 to vector<1x16xf32>
    %168 = arith.cmpf oge, %133, %167 : vector<1x16xf32>
    %169 = vector.broadcast %164 : vector<1x1xf32> to vector<1x16xf32>
    %170 = arith.mulf %133, %169 : vector<1x16xf32>
    %171 = vector.broadcast %166 : vector<1x1xf32> to vector<1x16xf32>
    %172 = arith.mulf %133, %171 : vector<1x16xf32>
    %173 = arith.select %168, %170, %172 : vector<1x16xi1>, vector<1x16xf32>
    %174 = vector.broadcast %173 : vector<1x16xf32> to vector<16x16xf32>
    %175 = arith.subf %162, %174 : vector<16x16xf32>
    %176 = math.exp %175 : vector<16x16xf32>
    %177 = tpu.iota {dimensions = array<i32: 0>} : vector<2x16xi32>
    %c0_i32_73 = arith.constant 0 : i32
    %178 = vector.broadcast %c0_i32_73 : i32 to vector<2x16xi32>
    %179 = arith.cmpi eq, %177, %178 : vector<2x16xi32>
    %180 = vector.shape_cast %133 : vector<1x16xf32> to vector<1x16xf32>
    %181 = vector.broadcast %180 : vector<1x16xf32> to vector<2x16xf32>
    %cst_74 = arith.constant 1.000000e+00 : f32
    %182 = vector.broadcast %cst_74 : f32 to vector<2x16xf32>
    %183 = arith.select %179, %181, %182 : vector<2x16xi1>, vector<2x16xf32>
    %cst_75 = arith.constant dense<0.000000e+00> : vector<2x16xf32>
    %184 = tpu.matmul %183, %176, %cst_75 {dimension_numbers = #tpu.dot_dimension_numbers<[1], [0], [0], [1], [0, 0, 1, 1], [], []>} : vector<2x16xf32>, vector<16x16xf32>, vector<2x16xf32> -> vector<2x16xf32>
    %185 = vector.extract_strided_slice %184 {offsets = [0, 0], sizes = [1, 16], strides = [1, 1]} : vector<2x16xf32> to vector<1x16xf32>
    %186 = vector.extract_strided_slice %184 {offsets = [1, 0], sizes = [1, 16], strides = [1, 1]} : vector<2x16xf32> to vector<1x16xf32>
    %187 = tpu.reciprocal %186 {approx = true} : vector<1x16xf32> -> vector<1x16xf32>
    %188 = arith.mulf %185, %187 : vector<1x16xf32>
    %cst_76 = arith.constant dense<0.000000e+00> : vector<64x64xf32>
    %189 = tpu.matmul %134, %134, %cst_76 {dimension_numbers = #tpu.dot_dimension_numbers<[0], [0], [1], [1], [0, 1, 1, 1], [], []>} : vector<1x64xf32>, vector<1x64xf32>, vector<64x64xf32> -> vector<64x64xf32>
    %cst_77 = arith.constant dense<0xFF800000> : vector<1xf32>
    %190 = vector.multi_reduction <maximumf>, %134, %cst_77 [1] : vector<1x64xf32> to vector<1xf32>
    %191 = vector.shape_cast %190 : vector<1xf32> to vector<1x1xf32>
    %cst_78 = arith.constant dense<0x7F800000> : vector<1xf32>
    %192 = vector.multi_reduction <minimumf>, %134, %cst_78 [1] : vector<1x64xf32> to vector<1xf32>
    %193 = vector.shape_cast %192 : vector<1xf32> to vector<1x1xf32>
    %cst_79 = arith.constant 0.000000e+00 : f32
    %194 = vector.broadcast %cst_79 : f32 to vector<1x64xf32>
    %195 = arith.cmpf oge, %134, %194 : vector<1x64xf32>
    %196 = vector.broadcast %191 : vector<1x1xf32> to vector<1x64xf32>
    %197 = arith.mulf %134, %196 : vector<1x64xf32>
    %198 = vector.broadcast %193 : vector<1x1xf32> to vector<1x64xf32>
    %199 = arith.mulf %134, %198 : vector<1x64xf32>
    %200 = arith.select %195, %197, %199 : vector<1x64xi1>, vector<1x64xf32>
    %201 = vector.broadcast %200 : vector<1x64xf32> to vector<64x64xf32>
    %202 = arith.subf %189, %201 : vector<64x64xf32>
    %203 = math.exp %202 : vector<64x64xf32>
    %204 = tpu.iota {dimensions = array<i32: 0>} : vector<2x64xi32>
    %c0_i32_80 = arith.constant 0 : i32
    %205 = vector.broadcast %c0_i32_80 : i32 to vector<2x64xi32>
    %206 = arith.cmpi eq, %204, %205 : vector<2x64xi32>
    %207 = vector.shape_cast %134 : vector<1x64xf32> to vector<1x64xf32>
    %208 = vector.broadcast %207 : vector<1x64xf32> to vector<2x64xf32>
    %cst_81 = arith.constant 1.000000e+00 : f32
    %209 = vector.broadcast %cst_81 : f32 to vector<2x64xf32>
    %210 = arith.select %206, %208, %209 : vector<2x64xi1>, vector<2x64xf32>
    %cst_82 = arith.constant dense<0.000000e+00> : vector<2x64xf32>
    %211 = tpu.matmul %210, %203, %cst_82 {dimension_numbers = #tpu.dot_dimension_numbers<[1], [0], [0], [1], [0, 0, 1, 1], [], []>} : vector<2x64xf32>, vector<64x64xf32>, vector<2x64xf32> -> vector<2x64xf32>
    %212 = vector.extract_strided_slice %211 {offsets = [0, 0], sizes = [1, 64], strides = [1, 1]} : vector<2x64xf32> to vector<1x64xf32>
    %213 = vector.extract_strided_slice %211 {offsets = [1, 0], sizes = [1, 64], strides = [1, 1]} : vector<2x64xf32> to vector<1x64xf32>
    %214 = tpu.reciprocal %213 {approx = true} : vector<1x64xf32> -> vector<1x64xf32>
    %215 = arith.mulf %212, %214 : vector<1x64xf32>
    %216 = vector.broadcast %161 : vector<1x16xf32> to vector<2x16xf32>
    %217 = arith.mulf %15, %216 : vector<2x16xf32>
    %cst_83 = arith.constant dense<0.000000e+00> : vector<2x8xf32>
    %218 = tpu.matmul %217, %14, %cst_83 {dimension_numbers = #tpu.dot_dimension_numbers<[1], [0], [0], [1], [0, 0, 1, 1], [], []>} : vector<2x16xf32>, vector<16x8xf32>, vector<2x8xf32> -> vector<2x8xf32>
    %219 = vector.broadcast %188 : vector<1x16xf32> to vector<2x16xf32>
    %220 = arith.mulf %15, %219 : vector<2x16xf32>
    %cst_84 = arith.constant dense<0.000000e+00> : vector<2x8xf32>
    %221 = tpu.matmul %220, %14, %cst_84 {dimension_numbers = #tpu.dot_dimension_numbers<[1], [0], [0], [1], [0, 0, 1, 1], [], []>} : vector<2x16xf32>, vector<16x8xf32>, vector<2x8xf32> -> vector<2x8xf32>
    %cst_85 = arith.constant dense<0.000000e+00> : vector<2x64xf32>
    %222 = tpu.matmul %218, %16, %cst_85 {dimension_numbers = #tpu.dot_dimension_numbers<[1], [0], [0], [1], [0, 0, 1, 1], [], []>} : vector<2x8xf32>, vector<8x64xf32>, vector<2x64xf32> -> vector<2x64xf32>
    %cst_86 = arith.constant dense<0.000000e+00> : vector<2x64xf32>
    %223 = tpu.matmul %221, %17, %cst_86 {dimension_numbers = #tpu.dot_dimension_numbers<[1], [0], [0], [1], [0, 0, 1, 1], [], []>} : vector<2x8xf32>, vector<8x64xf32>, vector<2x64xf32> -> vector<2x64xf32>
    %224 = arith.addf %222, %223 : vector<2x64xf32>
    %225 = arith.mulf %224, %123 : vector<2x64xf32>
    %c0_87 = arith.constant 0 : index
    %c64 = arith.constant 64 : index
    %226 = vector.load %arg15[%c0_87, %c64] : memref<2x128xf32, #tpu.memory_space<vmem>>, vector<2x64xf32>
    tpu.vector_store %arg15[%c0_87, %c64], %225 {strides = array<i32>} : memref<2x128xf32, #tpu.memory_space<vmem>>, vector<2x64xf32>,
    %c0_88 = arith.constant 0 : index
    %c64_89 = arith.constant 64 : index
    %227 = vector.load %arg16[%c0_88, %c64_89] : memref<1x128xf32, #tpu.memory_space<vmem>>, vector<1x64xf32>
    tpu.vector_store %arg16[%c0_88, %c64_89], %215 {strides = array<i32>} : memref<1x128xf32, #tpu.memory_space<vmem>>, vector<1x64xf32>,
    %c0_90 = arith.constant 0 : index
    %c0_91 = arith.constant 0 : index
    %228 = vector.load %arg4[%c0_90, %c0_91] : memref<32x2xf32, #tpu.memory_space<vmem>>, vector<32x2xf32>
    %c0_92 = arith.constant 0 : index
    %c0_93 = arith.constant 0 : index
    %229 = vector.load %arg15[%c0_92, %c0_93] : memref<2x128xf32, #tpu.memory_space<vmem>>, vector<2x128xf32>
    %cst_94 = arith.constant dense<0.000000e+00> : vector<32x128xf32>
    %230 = tpu.matmul %228, %229, %cst_94 {dimension_numbers = #tpu.dot_dimension_numbers<[1], [0], [0], [1], [0, 0, 1, 1], [], []>} : vector<32x2xf32>, vector<2x128xf32>, vector<32x128xf32> -> vector<32x128xf32>
    %c0_95 = arith.constant 0 : index
    %c0_96 = arith.constant 0 : index
    %231 = vector.load %arg5[%c0_95, %c0_96] : memref<32x1xf32, #tpu.memory_space<vmem>>, vector<32x1xf32>
    %232 = vector.broadcast %231 : vector<32x1xf32> to vector<32x128xf32>
    %233 = arith.addf %230, %232 : vector<32x128xf32>
    %c0_97 = arith.constant 0 : index
    %c0_98 = arith.constant 0 : index
    %234 = vector.load %arg16[%c0_97, %c0_98] : memref<1x128xf32, #tpu.memory_space<vmem>>, vector<1x128xf32>
    %235 = vector.broadcast %234 : vector<1x128xf32> to vector<32x128xf32>
    %236 = arith.mulf %1, %235 : vector<32x128xf32>
    %c0_99 = arith.constant 0 : index
    %c0_100 = arith.constant 0 : index
    %237 = memref.load %arg13[%c0_99, %c0_100] : memref<1x1xf32, #tpu.memory_space<smem>>
    %238 = vector.broadcast %237 : f32 to vector<32x128xf32>
    %239 = arith.mulf %238, %233 : vector<32x128xf32>
    %240 = arith.addf %236, %239 : vector<32x128xf32>
    %c0_101 = arith.constant 0 : index
    %c0_102 = arith.constant 0 : index
    %c0_103 = arith.constant 0 : index
    %241 = vector.load %arg14[%c0_101, %c0_102, %c0_103] : memref<1x32x128xf32, #tpu.memory_space<vmem>>, vector<1x32x128xf32>
    %242 = vector.shape_cast %241 : vector<1x32x128xf32> to vector<32x128xf32>
    %243 = vector.shape_cast %240 : vector<32x128xf32> to vector<1x32x128xf32>
    tpu.vector_store %arg14[%c0_101, %c0_102, %c0_103], %243 {strides = array<i32>} : memref<1x32x128xf32, #tpu.memory_space<vmem>>, vector<1x32x128xf32>,
    return
  }
  func.func @transform_0(%arg0: i32) -> (i32, i32, i32) {
    %c0_i32 = arith.constant 0 : i32
    %c0_i32_0 = arith.constant 0 : i32
    %c0_i32_1 = arith.constant 0 : i32
    return %arg0, %c0_i32, %c0_i32_0 : i32, i32, i32
  }
  func.func @transform_1(%arg0: i32) -> (i32, i32) {
    %c0_i32 = arith.constant 0 : i32
    %c0_i32_0 = arith.constant 0 : i32
    %c0_i32_1 = arith.constant 0 : i32
    return %c0_i32, %c0_i32_0 : i32, i32
  }
  func.func @transform_2(%arg0: i32) -> (i32, i32) {
    %c0_i32 = arith.constant 0 : i32
    %c0_i32_0 = arith.constant 0 : i32
    %c0_i32_1 = arith.constant 0 : i32
    return %c0_i32, %c0_i32_0 : i32, i32
  }
  func.func @transform_3(%arg0: i32) -> (i32, i32) {
    %c0_i32 = arith.constant 0 : i32
    %c0_i32_0 = arith.constant 0 : i32
    %c0_i32_1 = arith.constant 0 : i32
    return %c0_i32, %c0_i32_0 : i32, i32
  }
  func.func @transform_4(%arg0: i32) -> (i32, i32) {
    %c0_i32 = arith.constant 0 : i32
    %c0_i32_0 = arith.constant 0 : i32
    %c0_i32_1 = arith.constant 0 : i32
    return %c0_i32, %c0_i32_0 : i32, i32
  }
  func.func @transform_5(%arg0: i32) -> (i32, i32) {
    %c0_i32 = arith.constant 0 : i32
    %c0_i32_0 = arith.constant 0 : i32
    %c0_i32_1 = arith.constant 0 : i32
    return %c0_i32, %c0_i32_0 : i32, i32
  }
  func.func @transform_6(%arg0: i32) -> (i32, i32) {
    %c0_i32 = arith.constant 0 : i32
    %c0_i32_0 = arith.constant 0 : i32
    %c0_i32_1 = arith.constant 0 : i32
    return %c0_i32, %c0_i32_0 : i32, i32
  }
  func.func @transform_7(%arg0: i32) -> (i32, i32) {
    %c0_i32 = arith.constant 0 : i32
    %c0_i32_0 = arith.constant 0 : i32
    %c0_i32_1 = arith.constant 0 : i32
    return %c0_i32, %c0_i32_0 : i32, i32
  }
  func.func @transform_8(%arg0: i32) -> (i32, i32) {
    %c0_i32 = arith.constant 0 : i32
    %c0_i32_0 = arith.constant 0 : i32
    %c0_i32_1 = arith.constant 0 : i32
    return %c0_i32, %c0_i32_0 : i32, i32
  }
  func.func @transform_9(%arg0: i32) -> (i32, i32) {
    %c0_i32 = arith.constant 0 : i32
    %c0_i32_0 = arith.constant 0 : i32
    %c0_i32_1 = arith.constant 0 : i32
    return %c0_i32, %c0_i32_0 : i32, i32
  }
  func.func @transform_10(%arg0: i32) -> (i32, i32) {
    %c0_i32 = arith.constant 0 : i32
    %c0_i32_0 = arith.constant 0 : i32
    %c0_i32_1 = arith.constant 0 : i32
    return %c0_i32, %c0_i32_0 : i32, i32
  }
  func.func @transform_11(%arg0: i32) -> (i32, i32) {
    %c0_i32 = arith.constant 0 : i32
    %c0_i32_0 = arith.constant 0 : i32
    %c0_i32_1 = arith.constant 0 : i32
    return %c0_i32, %c0_i32_0 : i32, i32
  }
  func.func @transform_12(%arg0: i32) -> (i32, i32) {
    %c0_i32 = arith.constant 0 : i32
    %c0_i32_0 = arith.constant 0 : i32
    %c0_i32_1 = arith.constant 0 : i32
    return %c0_i32, %c0_i32_0 : i32, i32
  }
  func.func @transform_13(%arg0: i32) -> (i32, i32, i32) {
    %c0_i32 = arith.constant 0 : i32
    %c0_i32_0 = arith.constant 0 : i32
    %c0_i32_1 = arith.constant 0 : i32
    return %arg0, %c0_i32, %c0_i32_0 : i32, i32, i32
  }
}

</mosaic_0001>

<bundles_post_ra>
// kernel: _oab_forward_impl.1
= control target key start
LH: loop header
LB: loop body
LE: loop exit
PB: predicated region body
PF: predicated region fallthrough
CT: control target
= control target key end

     0   :  { %v1549_v2 = vmov 0   ;;  %vm56_vm0 = vcmask 261120   ;;  %vm118_vm1 = vcmask 523264   ;;  %vm142_vm2 = vcmask 64512   ;;  %s2020_s0 = inlined_call_operand.vmem [shape: f32[1,32,128], index: 0, kind: input, shape index: {}]   ;;  %s2021_s2 = inlined_call_operand.vmem [shape: f32[2,1], index: 2, kind: input, shape index: {}]   ;;  %s2022_s5 = inlined_call_operand.vmem [shape: f32[64,8], index: 5, kind: input, shape index: {}]   ;;  %s2023_s6 = inlined_call_operand.vmem [shape: f32[64,8], index: 6, kind: input, shape index: {}]   ;;  %s2024_s1 = inlined_call_operand.vmem [shape: f32[2,32], index: 1, kind: input, shape index: {}]   ;;  %s2025_s7 = inlined_call_operand.vmem [shape: f32[8,16], index: 7, kind: input, shape index: {}]   ;;  %s2026_s9 = inlined_call_operand.vmem [shape: f32[2,16], index: 9, kind: input, shape index: {}]   ;;  %s2027_s8 = inlined_call_operand.vmem [shape: f32[16,8], index: 8, kind: input, shape index: {}]   ;;  %s2028_s10 = inlined_call_operand.vmem [shape: f32[8,64], index: 10, kind: input, shape index: {}]   ;;  %s2029_s11 = inlined_call_operand.vmem [shape: f32[8,64], index: 11, kind: input, shape index: {}]   ;;  %s2030_s4 = inlined_call_operand.vmem [shape: f32[32,1], index: 4, kind: input, shape index: {}]   ;;  %s2031_s3 = inlined_call_operand.vmem [shape: f32[32,2], index: 3, kind: input, shape index: {}]   ;;  %s2032_s12 = inlined_call_operand.<no memory space> [shape: f32[1,1], index: 12, kind: input, shape index: {}]   ;;  %s2033_s13 = inlined_call_operand.vmem [shape: f32[1,32,128], index: 13, kind: output, shape index: {}]  }
   0x1   :  { %v48_v0 = vld [vmem:[%s2020_s0 + $0x18] sm:$0xff]  ;;  %v47_v1 = vld [vmem:[%s2020_s0 + $0x10] sm:$0xff]  ;;  %1480 = vset.pattern.permute.xlu0 %v1549_v2  ;;  %v46_v3 = vld [vmem:[%s2020_s0 + $0x8] sm:$0xff]  ;;  %vm167_vm3 = vcmask 123904   ;;  %vm80_vm4 = vcmask 1041408   ;;  %v1550_v38 = vmov 2.0  }
   0x2   :  { %72 = vmatpush.msra.mxu0 %v48_v0  ;;  %v50_v4 = vld [vmem:[%s2021_s2] sm:$0x3]  ;;  %v1638_v5 = vld [vmem:[%s2022_s5 + $0x38] sm:$0xff]  ;;  %v1648_v7 = vld [vmem:[%s2022_s5 + $0x30] sm:$0xff]  ;;  %1483 = vrcp.f32 %v1550_v38  ;;  %vm265_vm5 = vcmask 1040384   ;;  %vm292_vm6 = vcmask 130048  }
   0x3   :  { %53 = vperm.xlu0 %1480, %v50_v4   ;;  %v1643_v6 = vld [vmem:[%s2023_s6 + $0x38] sm:$0xff]  ;;  %130 = vmatpush.msra.mxu1 %v1638_v5  ;;  %v1654_v8 = vld [vmem:[%s2023_s6 + $0x30] sm:$0xff]  ;;  %v45_v9 = vld [vmem:[%s2020_s0] sm:$0xff]  ;;  %vm258_vm8 = vcmask 7168   ;;  %vm1140_vm9 = vcmask 1048064   ;;  %vm712_vm14 = vcmask 516096  }
   0x4   :  { %73 = vmatpush.msra.mxu0 %v47_v1  ;;  %183 = vmatpush.msra.mxu3 %v1643_v6  ;;  %v1663_v10 = vld [vmem:[%s2022_s5 + $0x28] sm:$0xff]  ;;  %v49_v11 = vld [vmem:[%s2024_s1] sm:$0x3]  ;;  %v1690_v15 = vld [vmem:[%s2022_s5 + $0x18] sm:$0xff]  ;;  %vm710_vm15 = vcmask 517120  }
   0x5   :  { %131 = vmatpush.msra.mxu1 %v1648_v7  ;;  %v1672_v12 = vld [vmem:[%s2023_s6 + $0x28] sm:$0xff]  ;;  %v1678_v13 = vld [vmem:[%s2022_s5 + $0x20] sm:$0xff]  ;;  %v1696_v16 = vld [vmem:[%s2023_s6 + $0x18] sm:$0xff] }
   0x6   :  { %74 = vmatpush.msra.mxu0 %v46_v3  ;;  %184 = vmatpush.msra.mxu3 %v1654_v8  ;;  %v1684_v14 = vld [vmem:[%s2023_s6 + $0x20] sm:$0xff]  ;;  %v1702_v17 = vld [vmem:[%s2022_s5 + $0x10] sm:$0xff]  ;;  %v1714_v19 = vld [vmem:[%s2022_s5 + $0x8] sm:$0xff] }
   0x7   :  { %132 = vmatpush.msra.mxu1 %v1663_v10  ;;  %v1708_v18 = vld [vmem:[%s2023_s6 + $0x10] sm:$0xff]  ;;  %v1720_v20 = vld [vmem:[%s2023_s6 + $0x8] sm:$0xff]  ;;  %v1728_v21 = vld [vmem:[%s2022_s5] sm:$0xff] }
   0x8   :  { %75 = vmatpush.msra.mxu0 %v45_v9  ;;  %185 = vmatpush.msra.mxu3 %v1672_v12  ;;  %v1733_v22 = vld [vmem:[%s2023_s6] sm:$0xff]  ;;  %v1484_v47 = vpop.eup %1483 }
   0x9   :  { %1417 = vmatmul.msk.f32.vlgmr.msra.gmra.mxu0 %vm56_vm0, %v49_v11  ;;  %133 = vmatpush.msra.mxu1 %v1678_v13  ;;  %v1746_v26 = vld [vmem:[%s2025_s7] sm:$0xff]  ;;  %v89_v52 = vmul.f32 2.0, %v1484_v47  ;;  %vm93_vm7 = vweird.f32 %v1484_v47  ;;  %s1551_s7 = smov 64  }
   0xa   :  { %186 = vmatpush.msra.mxu3 %v1684_v14  ;;  %161 = vmatpush.msra.mxu2 %v1746_v26  ;;  %v1755_v29 = vld [vmem:[%s2026_s9] sm:$0x3] }
   0xb   :  { %134 = vmatpush.msra.mxu1 %v1690_v15  ;;  %v90_v56 = vsub.f32 1.0, %v89_v52 }
   0xc   :  { %187 = vmatpush.msra.mxu3 %v1696_v16  ;;  %213 = vmatpush.msrb.mxu2 %v1746_v26 }
   0xd   :  { %135 = vmatpush.msra.mxu1 %v1702_v17  ;;  %v91_v59 = vmul.f32 %v1484_v47, %v90_v56 }
   0xe   :  { %188 = vmatpush.msra.mxu3 %v1708_v18 }
   0xf   :  { %136 = vmatpush.msra.mxu1 %v1714_v19  ;;  %v92_v61 = vadd.f32 %v1484_v47, %v91_v59 }
  0x10   :  { %189 = vmatpush.msra.mxu3 %v1720_v20 }
  0x11   :  { %137 = vmatpush.msra.mxu1 %v1728_v21  ;;  %v94_v0 = vsel %vm93_vm7, %v1484_v47, %v92_v61 }
  0x12   :  { %190 = vmatpush.msra.mxu3 %v1733_v22 }
  0x75   :  { %v54_v23 = vpop.permute.xlu0 %53 }
  0x86   :  { %v77_v24 = vpop.f32.mrf.mxu0 }
  0x87   :  { %v1737_v25 = vadd.f32 %v77_v24, %v54_v23 }
  0x89   :  { %1418 = vmatmul.msk.f32.vlgmr.msra.gmra.mxu1 %vm118_vm1, %v1737_v25  ;;  %1420 = vmatmul.msk.f32.vlgmr.msra.gmra.mxu3 %vm118_vm1, %v1737_v25  ;;  %v81_v40 = vsel %vm80_vm4, %v1737_v25, 0.0 }
  0x8a   :  { %v82_v44 = vrot.slane %v81_v40, 4 }
  0x8c   :  { %v83_v50 = vadd.f32 %v82_v44, %v81_v40 }
  0x8e   :  { %v84_v54 = vrot.slane %v83_v50, 2 }
  0x90   :  { %v85_v58 = vadd.f32 %v84_v54, %v83_v50 }
  0x92   :  { %v86_v60 = vrot.slane %v85_v58, 1 }
  0x94   :  { %v87_v63 = vadd.f32 %v86_v60, %v85_v58 }
  0x96   :  { %v1777_v1 = vmul.f32 %v94_v0, %v87_v63 }
  0x98   :  { %v553_v4 = vsel %vm118_vm1, %v1777_v1, inf  ;;  %v550_v23 = vsel %vm118_vm1, %v1777_v1, -inf  ;;  %v1141_v24 = vsel %vm1140_vm9, %v1777_v1, -inf  ;;  %vm556_vm13 = vcmp.ge.f32.partialorder %v1777_v1, 0.0 }
 0x106   :  { %v139_v27 = vpop.f32.mrf.mxu1 }
 0x107   :  { %1419 = vmatmul.msk.f32.vlgmr.msra.gmra.mxu2 %vm142_vm2, %v139_v27  ;;  %v309_v27 = vlaneseq }
 0x10c   :  { %v192_v28 = vpop.f32.mrf.mxu3 }
 0x10f   :  { %1421 = vmatmul.msk.f32.vlgmr.msrb.gmra.mxu2 %vm142_vm2, %v192_v28  ;;  %v1793_v28 = vshrl.u32 %v309_v27, 7 }
 0x111   :  { %vm311_vm10 = vcmp.eq.s32.totalorder %v1793_v28, 0 }
 0x18a   :  { %v163_v30 = vpop.f32.mrf.mxu2 }
 0x18b   :  { %v166_v31 = vmul.f32 %v163_v30, %v1755_v29 }
 0x18d   :  { %v168_v32 = vsel %vm167_vm3, %v166_v31, 0.0 }
 0x18e   :  { %v169_v33 = vrot.slane %v168_v32, 4 }
 0x190   :  { %v170_v34 = vadd.f32 %v169_v33, %v168_v32 }
 0x192   :  { %v171_v35 = vrot.slane %v170_v34, 2  ;;  %v215_v36 = vpop.f32.mrf.mxu2 }
 0x193   :  { %v218_v37 = vmul.f32 %v215_v36, %v1755_v29 }
 0x194   :  { %v172_v39 = vadd.f32 %v171_v35, %v170_v34 }
 0x195   :  { %v219_v41 = vsel %vm167_vm3, %v218_v37, 0.0 }
 0x196   :  { %v173_v42 = vrot.slane %v172_v39, 1  ;;  %v220_v43 = vrot.slane %v219_v41, 4 }
 0x198   :  { %v1763_v45 = vadd.f32 %v173_v42, %v172_v39  ;;  %v221_v46 = vadd.f32 %v220_v43, %v219_v41 }
 0x19a   :  { %v222_v48 = vrot.slane %v221_v46, 2  ;;  %226 = vxpose.xlu0.b32.start.end [1/1] (short) (narrow) %v1763_v45, 16  ;;  %1422 = vmatpush.msk.msrb.mxu0 %vm265_vm5, %v1763_v45  ;;  %v293_v49 = vsel %vm292_vm6, %v1763_v45, -inf  ;;  %v296_v57 = vsel %vm292_vm6, %v1763_v45, inf  ;;  %vm299_vm11 = vcmp.ge.f32.partialorder %v1763_v45, 0.0 }
 0x19b   :  { %294 = vmax.xlane.f32.xlu1 %v293_v49 }
 0x19c   :  { %v223_v51 = vadd.f32 %v222_v48, %v221_v46  ;;  %v312_v46 = vsel %vm311_vm10, %v1763_v45, 1.0 }
 0x19e   :  { %v224_v53 = vrot.slane %v223_v51, 1 }
 0x1a0   :  { %v1770_v55 = vadd.f32 %v224_v53, %v223_v51 }
 0x1a2   :  { %341 = vxpose.xlu2.b32.start.end [1/1] (short) (narrow) %v1770_v55, 16  ;;  %v405_v62 = vsel %vm292_vm6, %v1770_v55, -inf  ;;  %v408_v3 = vsel %vm292_vm6, %v1770_v55, inf  ;;  %vm411_vm12 = vcmp.ge.f32.partialorder %v1770_v55, 0.0 }
 0x1a3   :  { %297 = vmin.xlane.f32.xlu1 %v296_v57 }
 0x1ab   :  { %406 = vmax.xlane.f32.xlu1 %v405_v62 }
 0x1b2   :  { %450 = vxpose.xlu2.b32.start.end [1/1] (short) (narrow) %v1777_v1, 64 }
 0x1b3   :  { %409 = vmin.xlane.f32.xlu1 %v408_v3 }
 0x1bb   :  { %554 = vmin.xlane.f32.xlu1 %v553_v4 }
 0x1d4   :  { %714 = vrot.lane.b32.xlu1 %v1737_v25, %s1551_s7 }
 0x20e   :  { %v295_v30 = vpop.xlane.xlu1 %294 }
 0x20f   :  { %v300_v34 = vmul.f32 %v295_v30, %v1763_v45 }
 0x214   :  { %1481 = vset.pattern.permute.xlu2 %v1549_v2  ;;  %v1799_v2 = vsel %vm311_vm10, %v1777_v1, 1.0 }
 0x216   :  { %v298_v31 = vpop.xlane.xlu1 %297 }
 0x217   :  { %v301_v33 = vmul.f32 %v298_v31, %v1763_v45  ;;  %v1830_v31 = vld [vmem:[%s2027_s8 + $0x8] sm:$0xff] }
 0x219   :  { %v302_v35 = vsel %vm299_vm11, %v300_v34, %v301_v33  ;;  %v1839_v33 = vld [vmem:[%s2027_s8] sm:$0xff] }
 0x21e   :  { %v407_v54 = vpop.xlane.xlu1 %406 }
 0x21f   :  { %v412_v60 = vmul.f32 %v407_v54, %v1770_v55 }
 0x226   :  { %v410_v57 = vpop.xlane.xlu1 %409 }
 0x227   :  { %v413_v59 = vmul.f32 %v410_v57, %v1770_v55 }
 0x229   :  { %v414_v61 = vsel %vm411_vm12, %v412_v60, %v413_v59 }
 0x23b   :  { %v357_v41 = vpop.trf.xlu2 }
 0x23e   :  { %v242_v9 = vpop.trf.xlu0 }
 0x23f   :  { %1423 = vmatmul.msk.f32.vlgmr.msrb.gmra.mxu0 %vm258_vm8, %v242_v9 }
 0x243   :  { %v358_v44 = vpop.trf.xlu2 }
 0x246   :  { %v243_v11 = vpop.trf.xlu0 }
 0x247   :  { %1424 = vmatmul.msk.f32.gmra.mxu0 %vm258_vm8, %v243_v11 }
 0x24b   :  { %v466_v47 = vpop.trf.xlu2 }
 0x253   :  { %v467_v48 = vpop.trf.xlu2 }
 0x25b   :  { %551 = vmax.xlane.f32.xlu2 %v550_v23  ;;  %v468_v49 = vpop.trf.xlu2 }
 0x263   :  { %1142 = vmax.xlane.f32.xlu2 %v1141_v24  ;;  %v469_v45 = vpop.trf.xlu2 }
 0x26b   :  { %v470_v50 = vpop.trf.xlu2 }
 0x273   :  { %v471_v51 = vpop.trf.xlu2 }
 0x27b   :  { %1178 = vrot.lane.b32.xlu2 %v1799_v2, %s1551_s7  ;;  %v472_v52 = vpop.trf.xlu2 }
 0x283   :  { %v473_v53 = vpop.trf.xlu2 }
 0x2bc   :  { %v286_v32 = vpop.f32.mrf.mxu0 }
 0x2bd   :  { %v303_v36 = vsub.f32 %v286_v32, %v302_v35  ;;  %v421_v32 = vsel %vm311_vm10, %v1770_v55, 1.0 }
 0x2bf   :  { %v305_v39 = vmul.f32 1.442695, %v303_v36 }
 0x2c4   :  { %v289_v37 = vpop.f32.mrf.mxu0 }
 0x2c5   :  { %v304_v38 = vsub.f32 %v289_v37, %v302_v35 }
 0x2c7   :  { %v307_v40 = vmul.f32 1.442695, %v304_v38 }
 0x2c9   :  { %1485 = vpow2.f32 %v307_v40 }
 0x2ca   :  { %1487 = vpow2.f32 %v305_v39 }
 0x2ce   :  { %v552_v40 = vpop.xlane.xlu2 %551 }
 0x2cf   :  { %v1486_v42 = vpop.eup %1485 }
 0x2d0   :  { %330 = vmatpush.msra.mxu2 %v1486_v42  ;;  %v1488_v43 = vpop.eup %1487  ;;  %v555_v42 = vpop.xlane.xlu1 %554 }
 0x2d2   :  { %331 = vmatpush.msra.mxu2 %v1488_v43  ;;  %v557_v43 = vmul.f32 %v552_v40, %v1777_v1 }
 0x2d3   :  { %1425 = vmatmul.msk.f32.vlgmr.msra.gmra.mxu2 %vm292_vm6, %v312_v46 }
 0x2d4   :  { %1426 = vmatpush.msk.msrb.mxu2 %vm265_vm5, %v1770_v55 }
 0x2d6   :  { %1430 = vmatpush.msk.msra.mxu2 %vm265_vm5, %v1777_v1 }
 0x2db   :  { %1427 = vmatmul.msk.f32.vlgmr.msrb.gmra.mxu2 %vm258_vm8, %v357_v41 }
 0x2e3   :  { %1428 = vmatmul.msk.f32.gmra.mxu2 %vm258_vm8, %v358_v44  ;;  %v558_v44 = vmul.f32 %v555_v42, %v1777_v1 }
 0x2e5   :  { %v559_v46 = vsel %vm556_vm13, %v557_v43, %v558_v44 }
 0x2eb   :  { %1431 = vmatmul.msk.f32.vlgmr.msra.gmra.mxu2 %vm258_vm8, %v466_v47 }
 0x2f3   :  { %1432 = vmatmul.msk.f32.gmra.mxu2 %vm258_vm8, %v467_v48 }
 0x2fb   :  { %1433 = vmatmul.msk.f32.gmra.mxu2 %vm258_vm8, %v468_v49 }
 0x303   :  { %1434 = vmatmul.msk.f32.gmra.mxu2 %vm258_vm8, %v469_v45 }
 0x30b   :  { %1435 = vmatmul.msk.f32.gmra.mxu2 %vm258_vm8, %v470_v50 }
 0x313   :  { %1436 = vmatmul.msk.f32.gmra.mxu2 %vm258_vm8, %v471_v51 }
 0x31b   :  { %1437 = vmatmul.msk.f32.gmra.mxu2 %vm258_vm8, %v472_v52 }
 0x323   :  { %1438 = vmatmul.msk.f32.gmra.mxu2 %vm258_vm8, %v473_v53 }
 0x356   :  { %v333_v56 = vpop.f32.mrf.mxu2 }
 0x357   :  { %1489 = vrcp.f32 %v333_v56 }
 0x35d   :  { %v1490_v9 = vpop.eup %1489 }
 0x35e   :  { %v399_v58 = vpop.f32.mrf.mxu2  ;;  %v338_v23 = vrot.slane %v1490_v9, 1 }
 0x35f   :  { %v415_v62 = vsub.f32 %v399_v58, %v414_v61 }
 0x360   :  { %v340_v30 = vmul.f32 %v338_v23, %v333_v56 }
 0x361   :  { %v417_v3 = vmul.f32 1.442695, %v415_v62 }
 0x362   :  { %v613_v35 = vperm.slane %v340_v30, 0 }
 0x364   :  { %v614_v36 = vmul.f32 %v613_v35, %v1755_v29 }
 0x366   :  { %v402_v63 = vpop.f32.mrf.mxu2 }
 0x367   :  { %v416_v0 = vsub.f32 %v402_v63, %v414_v61 }
 0x369   :  { %v419_v4 = vmul.f32 1.442695, %v416_v0 }
 0x36b   :  { %1491 = vpow2.f32 %v419_v4 }
 0x36c   :  { %1493 = vpow2.f32 %v417_v3 }
 0x36e   :  { %v526_v11 = vpop.f32.mrf.mxu2 }
 0x36f   :  { %v560_v61 = vsub.f32 %v526_v11, %v559_v46 }
 0x371   :  { %v1492_v24 = vpop.eup %1491  ;;  %v568_v4 = vmul.f32 1.442695, %v560_v61 }
 0x372   :  { %439 = vmatpush.msrb.mxu3 %v1492_v24  ;;  %v1494_v27 = vpop.eup %1493 }
 0x374   :  { %440 = vmatpush.msrb.mxu3 %v1494_v27 }
 0x375   :  { %1429 = vmatmul.msk.f32.vlgmr.msrb.gmra.mxu3 %vm292_vm6, %v421_v32 }
 0x376   :  { %v529_v34 = vpop.f32.mrf.mxu2  ;;  %632 = vmatpush.msra.mxu3 %v1830_v31 }
 0x377   :  { %v561_v58 = vsub.f32 %v529_v34, %v559_v46 }
 0x378   :  { %633 = vmatpush.msra.mxu3 %v1839_v33 }
 0x379   :  { %v570_v0 = vmul.f32 1.442695, %v561_v58 }
 0x37d   :  { %1440 = vmatmul.msk.f32.vlgmr.msra.gmra.mxu3 %vm292_vm6, %v614_v36 }
 0x37e   :  { %v532_v37 = vpop.f32.mrf.mxu2 }
 0x37f   :  { %v562_v56 = vsub.f32 %v532_v37, %v559_v46 }
 0x381   :  { %v572_v62 = vmul.f32 1.442695, %v562_v56 }
 0x386   :  { %v535_v38 = vpop.f32.mrf.mxu2 }
 0x387   :  { %v563_v53 = vsub.f32 %v535_v38, %v559_v46 }
 0x389   :  { %v574_v59 = vmul.f32 1.442695, %v563_v53 }
 0x38e   :  { %v538_v55 = vpop.f32.mrf.mxu2 }
 0x38f   :  { %v564_v50 = vsub.f32 %v538_v55, %v559_v46 }
 0x391   :  { %v576_v57 = vmul.f32 1.442695, %v564_v50 }
 0x396   :  { %v541_v39 = vpop.f32.mrf.mxu2 }
 0x397   :  { %v565_v49 = vsub.f32 %v541_v39, %v559_v46 }
 0x399   :  { %v578_v54 = vmul.f32 1.442695, %v565_v49 }
 0x39e   :  { %v544_v41 = vpop.f32.mrf.mxu2 }
 0x39f   :  { %v566_v47 = vsub.f32 %v544_v41, %v559_v46 }
 0x3a1   :  { %v580_v51 = vmul.f32 1.442695, %v566_v47 }
 0x3a6   :  { %v547_v48 = vpop.f32.mrf.mxu2 }
 0x3a7   :  { %v567_v45 = vsub.f32 %v547_v48, %v559_v46 }
 0x3a9   :  { %v582_v52 = vmul.f32 1.442695, %v567_v45 }
 0x3ab   :  { %1495 = vpow2.f32 %v582_v52 }
 0x3ac   :  { %1497 = vpow2.f32 %v580_v51 }
 0x3ad   :  { %1499 = vpow2.f32 %v578_v54 }
 0x3ae   :  { %1501 = vpow2.f32 %v576_v57 }
 0x3af   :  { %1503 = vpow2.f32 %v574_v59 }
 0x3b0   :  { %1505 = vpow2.f32 %v572_v62  ;;  %v1144_v62 = vsel %vm1140_vm9, %v1777_v1, inf }
 0x3b1   :  { %v1496_v60 = vpop.eup %1495  ;;  %1507 = vpow2.f32 %v570_v0 }
 0x3b2   :  { %596 = vmatpush.msra.mxu0 %v1496_v60  ;;  %v1498_v63 = vpop.eup %1497  ;;  %1509 = vpow2.f32 %v568_v4 }
 0x3b3   :  { %v1500_v3 = vpop.eup %1499 }
 0x3b4   :  { %597 = vmatpush.msra.mxu0 %v1498_v63  ;;  %v1502_v9 = vpop.eup %1501 }
 0x3b5   :  { %v1504_v23 = vpop.eup %1503 }
 0x3b6   :  { %598 = vmatpush.msra.mxu0 %v1500_v3  ;;  %v1506_v24 = vpop.eup %1505 }
 0x3b7   :  { %v1508_v11 = vpop.eup %1507 }
 0x3b8   :  { %599 = vmatpush.msra.mxu0 %v1502_v9  ;;  %v1510_v27 = vpop.eup %1509 }
 0x3ba   :  { %600 = vmatpush.msra.mxu0 %v1504_v23 }
 0x3bc   :  { %601 = vmatpush.msra.mxu0 %v1506_v24 }
 0x3be   :  { %602 = vmatpush.msra.mxu0 %v1508_v11 }
 0x3c0   :  { %603 = vmatpush.msra.mxu0 %v1510_v27 }
 0x3c1   :  { %1439 = vmatmul.msk.f32.vlgmr.msra.gmra.mxu0 %vm118_vm1, %v1799_v2  ;;  %v116_v2 = vld [vmem:[%s2028_s10] sm:$0xff] }
 0x3c2   :  { %657 = vmatpush.msrb.mxu0 %v1830_v31  ;;  %704 = vmatpush.msrb.mxu3 %v116_v2 }
 0x3c3   :  { %1298 = vmatpush.msrb.mxu2 %v116_v2 }
 0x3c4   :  { %658 = vmatpush.msrb.mxu0 %v1839_v33  ;;  %777 = vmatpush.msra.mxu3 %v1643_v6 }
 0x3c6   :  { %726 = vmatpush.msra.mxu0 %v1638_v5  ;;  %778 = vmatpush.msra.mxu3 %v1654_v8 }
 0x3c8   :  { %727 = vmatpush.msra.mxu0 %v1648_v7  ;;  %779 = vmatpush.msra.mxu3 %v1672_v12 }
 0x3ca   :  { %728 = vmatpush.msra.mxu0 %v1663_v10  ;;  %780 = vmatpush.msra.mxu3 %v1684_v14  ;;  %v1875_v14 = vpop.permute.xlu1 %714 }
 0x3cc   :  { %729 = vmatpush.msra.mxu0 %v1678_v13  ;;  %781 = vmatpush.msra.mxu3 %v1696_v16 }
 0x3ce   :  { %730 = vmatpush.msra.mxu0 %v1690_v15  ;;  %782 = vmatpush.msra.mxu3 %v1708_v18 }
 0x3d0   :  { %731 = vmatpush.msra.mxu0 %v1702_v17  ;;  %783 = vmatpush.msra.mxu3 %v1720_v20 }
 0x3d2   :  { %732 = vmatpush.msra.mxu0 %v1714_v19  ;;  %784 = vmatpush.msra.mxu3 %v1733_v22  ;;  %v1885_v19 = vld [vmem:[%s2029_s11] sm:$0xff] }
 0x3d3   :  { %681 = vmatpush.msrb.mxu1 %v1885_v19 }
 0x3d4   :  { %733 = vmatpush.msra.mxu0 %v1728_v21 }
 0x3d5   :  { %756 = vmatpush.msra.mxu1 %v1746_v26 }
 0x3f8   :  { %v442_v5 = vpop.f32.mrf.mxu3 }
 0x3f9   :  { %1511 = vrcp.f32 %v442_v5 }
 0x3ff   :  { %v1512_v7 = vpop.eup %1511 }
 0x400   :  { %v447_v10 = vrot.slane %v1512_v7, 1  ;;  %v635_v13 = vpop.f32.mrf.mxu3  ;;  %v1143_v7 = vpop.xlane.xlu2 %1142 }
 0x401   :  { %1443 = vmatmul.msk.f32.vlgmr.msrb.gmra.mxu3 %vm142_vm2, %v635_v13 }
 0x402   :  { %v449_v6 = vmul.f32 %v447_v10, %v442_v5 }
 0x404   :  { %v638_v8 = vperm.slane %v449_v6, 0 }
 0x406   :  { %v639_v12 = vmul.f32 %v638_v8, %v1755_v29 }
 0x408   :  { %1441 = vmatmul.msk.f32.vlgmr.msrb.gmra.mxu0 %vm292_vm6, %v639_v12  ;;  %v1147_v12 = vmul.f32 %v1143_v7, %v1777_v1 }
 0x409   :  { %1446 = vmatmul.msk.f32.vlgmr.msra.gmra.mxu3 %vm118_vm1, %v1875_v14 }
 0x410   :  { %1444 = vmatmul.msk.f32.vlgmr.msra.gmra.mxu0 %vm118_vm1, %v1875_v14 }
 0x43e   :  { %v605_v15 = vpop.f32.mrf.mxu0 }
 0x43f   :  { %1513 = vrcp.f32 %v605_v15 }
 0x445   :  { %v1514_v16 = vpop.eup %1513 }
 0x446   :  { %v610_v17 = vrot.slane %v1514_v16, 1 }
 0x448   :  { %v612_v18 = vmul.f32 %v610_v17, %v605_v15 }
 0x44a   :  { %713 = vst.msk [vmem:[#allocation3] sm:$0x1] %vm712_vm14, %v612_v18 }
 0x484   :  { %v706_v21 = vpop.f32.mrf.mxu3 }
 0x485   :  { %v660_v20 = vpop.f32.mrf.mxu0 }
 0x486   :  { %1442 = vmatmul.msk.f32.vlgmr.msrb.gmra.mxu1 %vm142_vm2, %v660_v20 }
 0x487   :  { %807 = vmatpush.msrb.mxu1 %v1746_v26 }
 0x48c   :  { %v786_v30 = vpop.f32.mrf.mxu3 }
 0x48d   :  { %v735_v22 = vpop.f32.mrf.mxu0 }
 0x48e   :  { %1445 = vmatmul.msk.f32.vlgmr.msra.gmra.mxu1 %vm142_vm2, %v735_v22 }
 0x496   :  { %1447 = vmatmul.msk.f32.vlgmr.msrb.gmra.mxu1 %vm142_vm2, %v786_v30 }
 0x503   :  { %v683_v32 = vpop.f32.mrf.mxu1 }
 0x504   :  { %v707_v34 = vadd.f32 %v706_v21, %v683_v32 }
 0x506   :  { %v709_v35 = vmul.f32 %v707_v34, %v1737_v25 }
 0x508   :  { %711 = vst.msk [vmem:[#allocation2] sm:$0x3] %vm710_vm15, %v709_v35 }
 0x50b   :  { %v758_v36 = vpop.f32.mrf.mxu1 }
 0x50c   :  { %v761_v37 = vmul.f32 %v758_v36, %v1755_v29 }
 0x50e   :  { %v762_v38 = vsel %vm167_vm3, %v761_v37, 0.0 }
 0x50f   :  { %v763_v55 = vrot.slane %v762_v38, 4 }
 0x511   :  { %v764_v26 = vadd.f32 %v763_v55, %v762_v38 }
 0x513   :  { %v765_v39 = vrot.slane %v764_v26, 2  ;;  %v809_v40 = vpop.f32.mrf.mxu1 }
 0x514   :  { %v812_v41 = vmul.f32 %v809_v40, %v1755_v29 }
 0x515   :  { %v766_v42 = vadd.f32 %v765_v39, %v764_v26 }
 0x516   :  { %v813_v43 = vsel %vm167_vm3, %v812_v41, 0.0 }
 0x517   :  { %v767_v44 = vrot.slane %v766_v42, 1  ;;  %v814_v46 = vrot.slane %v813_v43, 4 }
 0x519   :  { %v1898_v47 = vadd.f32 %v767_v44, %v766_v42  ;;  %v815_v25 = vadd.f32 %v814_v46, %v813_v43 }
 0x51b   :  { %v816_v48 = vrot.slane %v815_v25, 2  ;;  %820 = vxpose.xlu0.b32.start.end [1/1] (short) (narrow) %v1898_v47, 16  ;;  %1448 = vmatpush.msk.msrb.mxu0 %vm265_vm5, %v1898_v47  ;;  %v884_v49 = vsel %vm292_vm6, %v1898_v47, -inf  ;;  %v887_v61 = vsel %vm292_vm6, %v1898_v47, inf  ;;  %vm890_vm3 = vcmp.ge.f32.partialorder %v1898_v47, 0.0 }
 0x51c   :  { %885 = vmax.xlane.f32.xlu1 %v884_v49  ;;  %v900_v22 = vsel %vm311_vm10, %v1898_v47, 1.0 }
 0x51d   :  { %v817_v45 = vadd.f32 %v816_v48, %v815_v25 }
 0x51f   :  { %v818_v50 = vrot.slane %v817_v45, 1 }
 0x521   :  { %v1905_v51 = vadd.f32 %v818_v50, %v817_v45 }
 0x523   :  { %1452 = vmatpush.msk.msrb.mxu3 %vm265_vm5, %v1905_v51  ;;  %v993_v52 = vsel %vm292_vm6, %v1905_v51, -inf  ;;  %v996_v53 = vsel %vm292_vm6, %v1905_v51, inf  ;;  %vm999_vm0 = vcmp.ge.f32.partialorder %v1905_v51, 0.0  ;;  %v1009_v26 = vsel %vm311_vm10, %v1905_v51, 1.0 }
 0x524   :  { %994 = vmax.xlane.f32.xlu1 %v993_v52 }
 0x52b   :  { %929 = vxpose.xlu0.b32.start.end [1/1] (short) (narrow) %v1905_v51, 16 }
 0x52c   :  { %997 = vmin.xlane.f32.xlu1 %v996_v53 }
 0x545   :  { %1038 = vrot.lane.b32.xlu1 %v1777_v1, %s1551_s7 }
 0x58f   :  { %v886_v54 = vpop.xlane.xlu1 %885 }
 0x590   :  { %v891_v27 = vmul.f32 %v886_v54, %v1898_v47 }
 0x597   :  { %v995_v56 = vpop.xlane.xlu1 %994 }
 0x598   :  { %v1000_v58 = vmul.f32 %v995_v56, %v1905_v51 }
 0x59f   :  { %v998_v57 = vpop.xlane.xlu1 %997 }
 0x5a0   :  { %v1001_v59 = vmul.f32 %v998_v57, %v1905_v51 }
 0x5a2   :  { %v1002_v60 = vsel %vm999_vm0, %v1000_v58, %v1001_v59 }
 0x5a4   :  { %888 = vmin.xlane.f32.xlu0 %v887_v61 }
 0x5ac   :  { %1145 = vmin.xlane.f32.xlu0 %v1144_v62 }
 0x5b7   :  { %v1039_v63 = vpop.permute.xlu1 %1038 }
 0x5b8   :  { %1475 = vmatpush.msk.msra.mxu3 %vm265_vm5, %v1039_v63  ;;  %1041 = vxpose.xlu1.b32.start.end [1/1] (short) (narrow) %v1039_v63, 64 }
 0x5b9   :  { %1456 = vmatpush.msk.msra.mxu0 %vm265_vm5, %v1039_v63  ;;  %vm1346_vm5 = vcmask 15360  }
 0x5bf   :  { %v836_v0 = vpop.trf.xlu0 }
 0x5c0   :  { %1449 = vmatmul.msk.f32.vlgmr.msrb.gmra.mxu0 %vm258_vm8, %v836_v0 }
 0x5c7   :  { %v837_v3 = vpop.trf.xlu0 }
 0x5c8   :  { %1450 = vmatmul.msk.f32.gmra.mxu0 %vm258_vm8, %v837_v3 }
 0x5cf   :  { %v945_v4 = vpop.trf.xlu0 }
 0x5d0   :  { %1453 = vmatmul.msk.f32.vlgmr.msrb.gmra.mxu3 %vm258_vm8, %v945_v4 }
 0x5d7   :  { %v946_v9 = vpop.trf.xlu0 }
 0x5d8   :  { %1454 = vmatmul.msk.f32.gmra.mxu3 %vm258_vm8, %v946_v9 }
 0x617   :  { %v889_v23 = vpop.xlane.xlu0 %888 }
 0x618   :  { %v892_v11 = vmul.f32 %v889_v23, %v1898_v47 }
 0x61a   :  { %v893_v5 = vsel %vm890_vm3, %v891_v27, %v892_v11 }
 0x61f   :  { %v1146_v2 = vpop.xlane.xlu0 %1145 }
 0x620   :  { %v1148_v13 = vmul.f32 %v1146_v2, %v1777_v1 }
 0x622   :  { %v1149_v17 = vsel %vm556_vm13, %v1147_v12, %v1148_v13 }
 0x63d   :  { %v878_v24 = vpop.f32.mrf.mxu0 }
 0x63e   :  { %v894_v10 = vsub.f32 %v878_v24, %v893_v5 }
 0x640   :  { %v896_v15 = vmul.f32 1.442695, %v894_v10 }
 0x645   :  { %v881_v6 = vpop.f32.mrf.mxu0 }
 0x646   :  { %v895_v8 = vsub.f32 %v881_v6, %v893_v5 }
 0x648   :  { %v898_v16 = vmul.f32 1.442695, %v895_v8 }
 0x64a   :  { %1515 = vpow2.f32 %v898_v16  ;;  %1151 = vrot.lane.b32.xlu1 %v1149_v17, %s1551_s7 }
 0x64b   :  { %1517 = vpow2.f32 %v896_v15 }
 0x650   :  { %v1516_v18 = vpop.eup %1515 }
 0x651   :  { %918 = vmatpush.msra.mxu1 %v1516_v18  ;;  %v1518_v20 = vpop.eup %1517 }
 0x653   :  { %919 = vmatpush.msra.mxu1 %v1518_v20  ;;  %v987_v21 = vpop.f32.mrf.mxu3 }
 0x654   :  { %1451 = vmatmul.msk.f32.vlgmr.msra.gmra.mxu1 %vm292_vm6, %v900_v22  ;;  %v1003_v30 = vsub.f32 %v987_v21, %v1002_v60  ;;  %v1179_v22 = vpop.permute.xlu2 %1178 }
 0x656   :  { %v1005_v35 = vmul.f32 1.442695, %v1003_v30 }
 0x65b   :  { %v990_v32 = vpop.f32.mrf.mxu3 }
 0x65c   :  { %v1004_v34 = vsub.f32 %v990_v32, %v1002_v60  ;;  %v1057_v1 = vpop.trf.xlu1 }
 0x65d   :  { %1457 = vmatmul.msk.f32.vlgmr.msra.gmra.mxu0 %vm258_vm8, %v1057_v1 }
 0x65e   :  { %v1007_v36 = vmul.f32 1.442695, %v1004_v34 }
 0x660   :  { %1519 = vpow2.f32 %v1007_v36 }
 0x661   :  { %1521 = vpow2.f32 %v1005_v35 }
 0x664   :  { %v1058_v37 = vpop.trf.xlu1 }
 0x665   :  { %1458 = vmatmul.msk.f32.gmra.mxu0 %vm258_vm8, %v1058_v37 }
 0x666   :  { %v1520_v38 = vpop.eup %1519 }
 0x667   :  { %1027 = vmatpush.msrb.mxu1 %v1520_v38  ;;  %v1522_v55 = vpop.eup %1521 }
 0x669   :  { %1028 = vmatpush.msrb.mxu1 %v1522_v55 }
 0x66a   :  { %1455 = vmatmul.msk.f32.vlgmr.msrb.gmra.mxu1 %vm292_vm6, %v1009_v26 }
 0x66b   :  { %1226 = vmatpush.msra.mxu1 %v1830_v31 }
 0x66c   :  { %v1059_v39 = vpop.trf.xlu1 }
 0x66d   :  { %1459 = vmatmul.msk.f32.gmra.mxu0 %vm258_vm8, %v1059_v39  ;;  %1227 = vmatpush.msra.mxu1 %v1839_v33  ;;  %v1325_v39 = vld [vmem:[%s2030_s4 + $0x18] sm:$0xff] }
 0x66f   :  { %1251 = vmatpush.msrb.mxu1 %v1830_v31 }
 0x671   :  { %1252 = vmatpush.msrb.mxu1 %v1839_v33 }
 0x674   :  { %v1060_v40 = vpop.trf.xlu1 }
 0x675   :  { %1460 = vmatmul.msk.f32.gmra.mxu0 %vm258_vm8, %v1060_v40 }
 0x67c   :  { %v1061_v41 = vpop.trf.xlu1 }
 0x67d   :  { %1461 = vmatmul.msk.f32.gmra.mxu0 %vm258_vm8, %v1061_v41  ;;  %v1317_v41 = vld [vmem:[%s2031_s3] sm:$0xff] }
 0x684   :  { %v1062_v28 = vpop.trf.xlu1 }
 0x685   :  { %1462 = vmatmul.msk.f32.vlgmr.msra.gmra.mxu3 %vm258_vm8, %v1062_v28 }
 0x68c   :  { %v1063_v42 = vpop.trf.xlu1 }
 0x68d   :  { %1463 = vmatmul.msk.f32.gmra.mxu3 %vm258_vm8, %v1063_v42 }
 0x694   :  { %v1064_v43 = vpop.trf.xlu1 }
 0x695   :  { %1464 = vmatmul.msk.f32.gmra.mxu3 %vm258_vm8, %v1064_v43  ;;  %v1324_v43 = vld [vmem:[%s2030_s4 + $0x10] sm:$0xff] }
 0x6bc   :  { %v1152_v60 = vpop.permute.xlu1 %1151 }
 0x6d1   :  { %v921_v44 = vpop.f32.mrf.mxu1 }
 0x6d2   :  { %1523 = vrcp.f32 %v921_v44 }
 0x6d8   :  { %v1524_v31 = vpop.eup %1523 }
 0x6d9   :  { %v926_v46 = vrot.slane %v1524_v31, 1  ;;  %v1319_v31 = vld [vmem:[%s2031_s3 + $0x10] sm:$0xff] }
 0x6da   :  { %v1116_v50 = vpop.f32.mrf.mxu0 }
 0x6db   :  { %v928_v33 = vmul.f32 %v926_v46, %v921_v44  ;;  %v1154_v10 = vsub.f32 %v1116_v50, %v1152_v60  ;;  %v1318_v44 = vld [vmem:[%s2031_s3 + $0x8] sm:$0xff]  ;;  %v1320_v46 = vld [vmem:[%s2031_s3 + $0x18] sm:$0xff] }
 0x6dd   :  { %v1207_v47 = vperm.slane %v928_v33, 0  ;;  %v1162_v15 = vmul.f32 1.442695, %v1154_v10 }
 0x6df   :  { %v1208_v25 = vmul.f32 %v1207_v47, %v1755_v29 }
 0x6e1   :  { %1466 = vmatmul.msk.f32.vlgmr.msra.gmra.mxu1 %vm292_vm6, %v1208_v25 }
 0x6e2   :  { %v1119_v54 = vpop.f32.mrf.mxu0 }
 0x6e3   :  { %v1155_v2 = vsub.f32 %v1119_v54, %v1152_v60 }
 0x6e5   :  { %v1164_v8 = vmul.f32 1.442695, %v1155_v2 }
 0x6e7   :  { %v1030_v48 = vpop.f32.mrf.mxu1 }
 0x6e8   :  { %1525 = vrcp.f32 %v1030_v48 }
 0x6ea   :  { %v1122_v56 = vpop.f32.mrf.mxu0 }
 0x6ee   :  { %v1526_v49 = vpop.eup %1525 }
 0x6ef   :  { %v1035_v45 = vrot.slane %v1526_v49, 1 }
 0x6f1   :  { %v1037_v51 = vmul.f32 %v1035_v45, %v1030_v48  ;;  %v1400_v48 = vstv %s2032_s12  ;;  %v1545_v45 = vld [vmem:[%s2020_s0] sm:$0xff] }
 0x6f2   :  { %v1125_v58 = vpop.f32.mrf.mxu0 }
 0x6f3   :  { %v1232_v52 = vperm.slane %v1037_v51, 0  ;;  %v1157_v24 = vsub.f32 %v1125_v58, %v1152_v60 }
 0x6f5   :  { %v1233_v53 = vmul.f32 %v1232_v52, %v1755_v29  ;;  %v1156_v29 = vsub.f32 %v1122_v56, %v1152_v60  ;;  %v1168_v5 = vmul.f32 1.442695, %v1157_v24 }
 0x6f7   :  { %1467 = vmatmul.msk.f32.vlgmr.msrb.gmra.mxu1 %vm292_vm6, %v1233_v53  ;;  %v1166_v13 = vmul.f32 1.442695, %v1156_v29  ;;  %v1548_v29 = vld [vmem:[%s2020_s0 + $0x18] sm:$0xff] }
 0x6fa   :  { %v1128_v62 = vpop.f32.mrf.mxu0 }
 0x6fb   :  { %v1158_v4 = vsub.f32 %v1128_v62, %v1152_v60 }
 0x6fd   :  { %v1170_v27 = vmul.f32 1.442695, %v1158_v4 }
 0x708   :  { %v1131_v57 = vpop.f32.mrf.mxu3 }
 0x709   :  { %v1159_v0 = vsub.f32 %v1131_v57, %v1152_v60  ;;  %v1546_v57 = vld [vmem:[%s2020_s0 + $0x8] sm:$0xff] }
 0x70b   :  { %v1172_v11 = vmul.f32 1.442695, %v1159_v0  ;;  %v1547_v0 = vld [vmem:[%s2020_s0 + $0x10] sm:$0xff] }
 0x710   :  { %v1134_v59 = vpop.f32.mrf.mxu3 }
 0x711   :  { %v1160_v61 = vsub.f32 %v1134_v59, %v1152_v60 }
 0x713   :  { %v1174_v9 = vmul.f32 1.442695, %v1160_v61 }
 0x718   :  { %v1137_v63 = vpop.f32.mrf.mxu3 }
 0x719   :  { %v1161_v3 = vsub.f32 %v1137_v63, %v1152_v60 }
 0x71b   :  { %v1176_v23 = vmul.f32 1.442695, %v1161_v3 }
 0x71d   :  { %1527 = vpow2.f32 %v1176_v23 }
 0x71e   :  { %1529 = vpow2.f32 %v1174_v9 }
 0x71f   :  { %1531 = vpow2.f32 %v1172_v11 }
 0x720   :  { %1533 = vpow2.f32 %v1170_v27 }
 0x721   :  { %1535 = vpow2.f32 %v1168_v5 }
 0x722   :  { %1537 = vpow2.f32 %v1166_v13 }
 0x723   :  { %v1528_v7 = vpop.eup %1527  ;;  %1539 = vpow2.f32 %v1164_v8 }
 0x724   :  { %1190 = vmatpush.msrb.mxu3 %v1528_v7  ;;  %v1530_v6 = vpop.eup %1529  ;;  %1541 = vpow2.f32 %v1162_v15 }
 0x725   :  { %v1532_v12 = vpop.eup %1531 }
 0x726   :  { %1191 = vmatpush.msrb.mxu3 %v1530_v6  ;;  %v1534_v16 = vpop.eup %1533 }
 0x727   :  { %v1536_v17 = vpop.eup %1535 }
 0x728   :  { %1192 = vmatpush.msrb.mxu3 %v1532_v12  ;;  %v1538_v18 = vpop.eup %1537 }
 0x729   :  { %v1540_v20 = vpop.eup %1539 }
 0x72a   :  { %1193 = vmatpush.msrb.mxu3 %v1534_v16  ;;  %v1542_v21 = vpop.eup %1541 }
 0x72c   :  { %1194 = vmatpush.msrb.mxu3 %v1536_v17 }
 0x72e   :  { %1195 = vmatpush.msrb.mxu3 %v1538_v18 }
 0x730   :  { %1196 = vmatpush.msrb.mxu3 %v1540_v20 }
 0x732   :  { %1197 = vmatpush.msrb.mxu3 %v1542_v21 }
 0x733   :  { %1465 = vmatmul.msk.f32.vlgmr.msrb.gmra.mxu3 %vm118_vm1, %v1179_v22  ;;  %vm1309_vm1 = vcmask 1041920  }
 0x734   :  { %1275 = vmatpush.msra.mxu3 %v1885_v19  ;;  %v1323_v19 = vld [vmem:[%s2030_s4 + $0x8] sm:$0xff] }
 0x75e   :  { %v1229_v30 = vpop.f32.mrf.mxu1 }
 0x75f   :  { %1469 = vmatmul.msk.f32.vlgmr.msrb.gmra.mxu2 %vm142_vm2, %v1229_v30 }
 0x774   :  { %v1254_v32 = vpop.f32.mrf.mxu1 }
 0x775   :  { %1468 = vmatmul.msk.f32.vlgmr.msra.gmra.mxu3 %vm142_vm2, %v1254_v32  ;;  %vm1315_vm2 = vcmask 1040896  }
 0x7b6   :  { %v1199_v34 = vpop.f32.mrf.mxu3 }
 0x7b7   :  { %1543 = vrcp.f32 %v1199_v34 }
 0x7bd   :  { %v1544_v38 = vpop.eup %1543 }
 0x7be   :  { %v1204_v55 = vrot.slane %v1544_v38, 1 }
 0x7c0   :  { %v1206_v26 = vmul.f32 %v1204_v55, %v1199_v34 }
 0x7e2   :  { %v1300_v1 = vpop.f32.mrf.mxu2 }
 0x7f8   :  { %v1277_v35 = vpop.f32.mrf.mxu3 }
 0x7f9   :  { %v1301_v36 = vadd.f32 %v1300_v1, %v1277_v35 }
 0x7fb   :  { %v1304_v37 = vmul.f32 %v1301_v36, %v1875_v14  ;;  %v1322_v14 = vld [vmem:[%s2030_s4] sm:$0xff] }
 0x7fc   :  { %1328 = vperm.xlu2 %1481, %v1322_v14  }
 0x7fd   :  { %1306 = vrot.lane.b32.xlu0 %v1304_v37, %s1551_s7 }
 0x804   :  { %1338 = vperm.xlu2 %1481, %v1324_v43  }
 0x805   :  { %1312 = vrot.lane.b32.xlu0 %v1206_v26, %s1551_s7 }
 0x80d   :  { %1333 = vperm.xlu0 %1480, %v1323_v19  }
 0x815   :  { %1343 = vperm.xlu0 %1480, %v1325_v39  }
 0x856   :  { %v1329_v33 = vpop.permute.xlu2 %1328 }
 0x85e   :  { %v1339_v61 = vpop.permute.xlu2 %1338 }
 0x86f   :  { %v1307_v40 = vpop.permute.xlu0 %1306 }
 0x870   :  { %1310 = vst.msk [vmem:[#allocation2] sm:$0x3] %vm1309_vm1, %v1307_v40 }
 0x877   :  { %v1313_v28 = vpop.permute.xlu0 %1312  ;;  %v1321_v42 = vld [vmem:[#allocation2] sm:$0x3] }
 0x878   :  { %1316 = vst.msk [vmem:[#allocation3] sm:$0x1] %vm1315_vm2, %v1313_v28  ;;  %1470 = vmatpush.msk.msra.mxu1 %vm80_vm4, %v1321_v42 }
 0x879   :  { %1471 = vmatmul.msk.f32.vlgmr.msra.gmra.mxu1 %vm1346_vm5, %v1317_v41 }
 0x87f   :  { %v1482_v47 = vld [vmem:[#allocation3] ss:$0 sm:$0xff]  ;;  %v1334_v53 = vpop.permute.xlu0 %1333 }
 0x880   :  { %v1395_v50 = vmul.f32 %v1545_v45, %v1482_v47  ;;  %v1396_v58 = vmul.f32 %v1546_v57, %v1482_v47  ;;  %v1397_v3 = vmul.f32 %v1547_v0, %v1482_v47  ;;  %v1398_v27 = vmul.f32 %v1548_v29, %v1482_v47 }
 0x881   :  { %1472 = vmatmul.msk.f32.gmra.mxu1 %vm1346_vm5, %v1318_v44 }
 0x887   :  { %v1344_v23 = vpop.permute.xlu0 %1343 }
 0x889   :  { %1473 = vmatmul.msk.f32.gmra.mxu1 %vm1346_vm5, %v1319_v31 }
 0x891   :  { %1474 = vmatmul.msk.f32.gmra.mxu1 %vm1346_vm5, %v1320_v46 }
 0x8f6   :  { %v1379_v25 = vpop.f32.mrf.mxu1 }
 0x8f7   :  { %v1380_v49 = vadd.f32 %v1379_v25, %v1329_v33 }
 0x8f9   :  { %v1401_v51 = vmul.f32 %v1400_v48, %v1380_v49 }
 0x8fb   :  { %v1405_v52 = vadd.f32 %v1401_v51, %v1395_v50 }
 0x8fd   :  { %1409 = vst [vmem:[%s2033_s13] sm:$0xff] %v1405_v52 }
 0x8fe   :  { %v1382_v54 = vpop.f32.mrf.mxu1 }
 0x8ff   :  { %v1383_v56 = vadd.f32 %v1382_v54, %v1334_v53 }
 0x901   :  { %v1402_v59 = vmul.f32 %v1400_v48, %v1383_v56 }
 0x903   :  { %v1406_v60 = vadd.f32 %v1402_v59, %v1396_v58 }
 0x905   :  { %1410 = vst [vmem:[%s2033_s13 + $0x8] sm:$0xff] %v1406_v60 }
 0x906   :  { %v1385_v62 = vpop.f32.mrf.mxu1 }
 0x907   :  { %v1386_v63 = vadd.f32 %v1385_v62, %v1339_v61 }
 0x909   :  { %v1403_v4 = vmul.f32 %v1400_v48, %v1386_v63 }
 0x90b   :  { %v1407_v9 = vadd.f32 %v1403_v4, %v1397_v3 }
 0x90d   :  { %1411 = vst [vmem:[%s2033_s13 + $0x10] sm:$0xff] %v1407_v9 }
 0x90e   :  { %v1388_v24 = vpop.f32.mrf.mxu1 }
 0x90f   :  { %v1389_v11 = vadd.f32 %v1388_v24, %v1344_v23 }
 0x911   :  { %v1404_v2 = vmul.f32 %v1400_v48, %v1389_v11 }
 0x913   :  { %v1408_v5 = vadd.f32 %v1404_v2, %v1398_v27 }
 0x915   :  { %1412 = vst [vmem:[%s2033_s13 + $0x18] sm:$0xff] %v1408_v5 }

</bundles_post_ra>
